<compile_context>
chip_gen: v7x
topology: tpu7x:2x2x1
jax: 0.10.0
libtpu: 0.0.40
codegen_flags: <defaults>
</compile_context>

<pallas_src>
import functools

import jax
import jax.numpy as jnp
from jax.experimental import pallas as pl
from jax.experimental.pallas import tpu as pltpu

F32 = jnp.float32
BF16 = jnp.bfloat16
LN_EPS = 1e-12

# 48 MiB fits v7x's 64 MiB physical VMEM with headroom and is plenty for the
# tile sizes used below even at BERT-base scale (on v5e/v6e it could be raised
# to ~96 MiB if larger tiles are desired).
VMEM_LIMIT = 48 * 1024 * 1024


def _vmem_capacity_bytes():
    try:
        return int(getattr(pltpu.get_tpu_info(), "vmem_capacity_bytes", 0) or 0)
    except Exception:
        return 0


_BIG_VMEM = _vmem_capacity_bytes() >= 120 * 1024 * 1024   # v5e / v6e class parts
DEF_TM = 1024 if _BIG_VMEM else 512    # row tile for dense / FFN / LayerNorm
DEF_TQ = 512 if _BIG_VMEM else 256     # q tile for attention


# ----------------------------------------------------------------------------
# helpers
# ----------------------------------------------------------------------------
def _tile(dim, preferred, align):
    """Largest multiple of `align` that divides `dim` and is <= preferred, else `dim`."""
    t = min(preferred, dim)
    t = (t // align) * align
    while t >= align:
        if dim % t == 0:
            return t
        t -= align
    return dim


def _cparams(sem):
    return pltpu.CompilerParams(dimension_semantics=sem,
                                vmem_limit_bytes=VMEM_LIMIT)


def _layernorm_f32(y, g, b):
    mu = jnp.mean(y, axis=-1, keepdims=True)
    var = jnp.mean(jnp.square(y - mu), axis=-1, keepdims=True)
    return (y - mu) * jax.lax.rsqrt(var + LN_EPS) * g + b


# ----------------------------------------------------------------------------
# embedding LayerNorm
# ----------------------------------------------------------------------------
def _emb_ln_kernel(x_ref, g_ref, b_ref, o_ref):
    y = _layernorm_f32(x_ref[...].astype(F32),
                       g_ref[...].astype(F32), b_ref[...].astype(F32))
    o_ref[...] = y.astype(o_ref.dtype)


def embedding_layernorm(x, gamma, beta, *, tm=None):
    M, H = x.shape
    tm = _tile(M, tm or DEF_TM, 16)
    return pl.pallas_call(
        _emb_ln_kernel,
        grid=(M // tm,),
        in_specs=[pl.BlockSpec((tm, H), lambda i: (i, 0)),
                  pl.BlockSpec((1, H), lambda i: (0, 0)),
                  pl.BlockSpec((1, H), lambda i: (0, 0))],
        out_specs=pl.BlockSpec((tm, H), lambda i: (i, 0)),
        out_shape=jax.ShapeDtypeStruct((M, H), BF16),
        compiler_params=_cparams(("parallel",)),
    )(x, gamma.reshape(1, H), beta.reshape(1, H))


# ----------------------------------------------------------------------------
# Q/K/V projection: one pass over x, three lane-dense (M, H) outputs.
# Weights are VMEM-resident (constant index map) — no K-grid re-streaming.
# ----------------------------------------------------------------------------
def _qkv_kernel(x_ref, wq_ref, wk_ref, wv_ref, bq_ref, bk_ref, bv_ref,
                q_ref, k_ref, v_ref):
    x = x_ref[...]
    q_ref[...] = (jnp.dot(x, wq_ref[...], preferred_element_type=F32)
                  + bq_ref[...].astype(F32)).astype(q_ref.dtype)
    k_ref[...] = (jnp.dot(x, wk_ref[...], preferred_element_type=F32)
                  + bk_ref[...].astype(F32)).astype(k_ref.dtype)
    v_ref[...] = (jnp.dot(x, wv_ref[...], preferred_element_type=F32)
                  + bv_ref[...].astype(F32)).astype(v_ref.dtype)


def qkv_dense(x, wq, bq, wk, bk, wv, bv, *, tm=None):
    M, H = x.shape
    tm = _tile(M, tm or DEF_TM, 16)
    row = pl.BlockSpec((tm, H), lambda i: (i, 0))
    wsp = pl.BlockSpec((H, H), lambda i: (0, 0))
    bsp = pl.BlockSpec((1, H), lambda i: (0, 0))
    out = jax.ShapeDtypeStruct((M, H), BF16)
    return pl.pallas_call(
        _qkv_kernel,
        grid=(M // tm,),
        in_specs=[row, wsp, wsp, wsp, bsp, bsp, bsp],
        out_specs=[row, row, row],
        out_shape=(out, out, out),
        compiler_params=_cparams(("parallel",)),
        cost_estimate=pl.CostEstimate(flops=6 * M * H * H, transcendentals=0,
                                      bytes_accessed=2 * (4 * M * H + 3 * H * H)),
    )(x, wq, wk, wv, bq.reshape(1, H), bk.reshape(1, H), bv.reshape(1, H))


# ----------------------------------------------------------------------------
# attention output projection + residual + LayerNorm (weight VMEM-resident)
# ----------------------------------------------------------------------------
def _dense_res_ln_kernel(x_ref, w_ref, b_ref, res_ref, g_ref, bt_ref, o_ref):
    y = jnp.dot(x_ref[...], w_ref[...], preferred_element_type=F32)
    y = y + b_ref[...].astype(F32) + res_ref[...].astype(F32)
    y = _layernorm_f32(y, g_ref[...].astype(F32), bt_ref[...].astype(F32))
    o_ref[...] = y.astype(o_ref.dtype)


def dense_res_ln(x, w, b, residual, gamma, beta, *, tm=None):
    M, K = x.shape
    N = w.shape[1]
    tm = _tile(M, tm or DEF_TM, 16)
    return pl.pallas_call(
        _dense_res_ln_kernel,
        grid=(M // tm,),
        in_specs=[pl.BlockSpec((tm, K), lambda i: (i, 0)),
                  pl.BlockSpec((K, N), lambda i: (0, 0)),
                  pl.BlockSpec((1, N), lambda i: (0, 0)),
                  pl.BlockSpec((tm, N), lambda i: (i, 0)),
                  pl.BlockSpec((1, N), lambda i: (0, 0)),
                  pl.BlockSpec((1, N), lambda i: (0, 0))],
        out_specs=pl.BlockSpec((tm, N), lambda i: (i, 0)),
        out_shape=jax.ShapeDtypeStruct((M, N), BF16),
        compiler_params=_cparams(("parallel",)),
        cost_estimate=pl.CostEstimate(flops=2 * M * K * N, transcendentals=0,
                                      bytes_accessed=2 * (2 * M * K + K * N + 2 * M * N)),
    )(x, w, b.reshape(1, N), residual, gamma.reshape(1, N), beta.reshape(1, N))


# ----------------------------------------------------------------------------
# fused FFN: gelu(x@w1 + b1) @ w2 + b2 + x, then LayerNorm.
# Weights VMEM-resident; the (tm, inter) intermediate never touches HBM; the
# residual is the kernel's own input (no extra DMA stream).
# ----------------------------------------------------------------------------
def _ffn_kernel(x_ref, w1_ref, b1_ref, w2_ref, b2_ref, g_ref, bt_ref, o_ref):
    x = x_ref[...]
    h = jnp.dot(x, w1_ref[...], preferred_element_type=F32) + b1_ref[...].astype(F32)
    # TODO(synk): HF BERT default GELU is the exact erf form; tanh approximation used here.
    h = jax.nn.gelu(h, approximate=True)
    y = jnp.dot(h.astype(w2_ref.dtype), w2_ref[...], preferred_element_type=F32)
    y = y + b2_ref[...].astype(F32) + x.astype(F32)
    y = _layernorm_f32(y, g_ref[...].astype(F32), bt_ref[...].astype(F32))
    o_ref[...] = y.astype(o_ref.dtype)


def ffn(x, w1, b1, w2, b2, gamma, beta, *, tm=None):
    M, H = x.shape
    inter = w1.shape[1]
    tm = _tile(M, tm or DEF_TM, 16)
    return pl.pallas_call(
        _ffn_kernel,
        grid=(M // tm,),
        in_specs=[pl.BlockSpec((tm, H), lambda i: (i, 0)),
                  pl.BlockSpec((H, inter), lambda i: (0, 0)),
                  pl.BlockSpec((1, inter), lambda i: (0, 0)),
                  pl.BlockSpec((inter, H), lambda i: (0, 0)),
                  pl.BlockSpec((1, H), lambda i: (0, 0)),
                  pl.BlockSpec((1, H), lambda i: (0, 0)),
                  pl.BlockSpec((1, H), lambda i: (0, 0))],
        out_specs=pl.BlockSpec((tm, H), lambda i: (i, 0)),
        out_shape=jax.ShapeDtypeStruct((M, H), BF16),
        compiler_params=_cparams(("parallel",)),
        cost_estimate=pl.CostEstimate(flops=4 * M * H * inter,
                                      transcendentals=M * inter,
                                      bytes_accessed=2 * (2 * M * H + 2 * H * inter)),
    )(x, w1, b1.reshape(1, inter), w2, b2.reshape(1, H),
      gamma.reshape(1, H), beta.reshape(1, H))


# ----------------------------------------------------------------------------
# attention: grid over (batch, head-groups, q-tiles).
# Q/K/V are read directly from the (M, H) projection buffers via column-sliced
# BlockSpecs (heads are contiguous dh-wide column bands, exactly the HF split),
# and the context is written directly into an (M, H) buffer with >=128-lane
# blocks (or full-H when the model is tiny) — no transposes, no HBM scores.
# ----------------------------------------------------------------------------
def _heads_per_block(num_heads, dh):
    # smallest head-group whose output slab is a multiple of 128 lanes,
    # else all heads (slab == H == the full last dim, also legal & lane-dense).
    for g in range(1, num_heads + 1):
        if num_heads % g == 0 and (g * dh) % 128 == 0:
            return g
    return num_heads


def _attn_kernel(q_ref, k_ref, v_ref, o_ref, *, scale, dh, heads):
    q = q_ref[...]                                # (tq, heads*dh)
    k = k_ref[...]                                # (S,  heads*dh)
    v = v_ref[...]
    outs = []
    for h in range(heads):
        lo = h * dh
        qh = q[:, lo:lo + dh]
        kh = k[:, lo:lo + dh]
        vh = v[:, lo:lo + dh]
        # NT matmul (contract dim 1 of both); the K-tile transpose runs on the XLU.
        s = jax.lax.dot_general(qh, kh, (((1,), (1,)), ((), ())),
                                preferred_element_type=F32) * scale      # (tq, S)
        s = s - jnp.max(s, axis=-1, keepdims=True)
        p = jnp.exp(s)
        l = jnp.sum(p, axis=-1, keepdims=True)
        oh = jnp.dot(p.astype(vh.dtype), vh, preferred_element_type=F32)  # (tq, dh)
        # deferred softmax normalization: multiply the small output, EUP reciprocal
        outs.append(oh * pl.reciprocal(l, approx=True))
    o = outs[0] if len(outs) == 1 else jnp.concatenate(outs, axis=-1)
    o_ref[...] = o.astype(o_ref.dtype)
    # TODO(synk): attention_mask not applied (reference is exercised with attention_mask=None).


def attention(q, k, v, *, batch, seq, num_heads, scale, tq=None):
    M, H = q.shape
    dh = H // num_heads
    g = _heads_per_block(num_heads, dh)
    gd = g * dh
    ng = num_heads // g
    tq = _tile(seq, tq or DEF_TQ, 16)
    qt = seq // tq
    kernel = functools.partial(_attn_kernel, scale=scale, dh=dh, heads=g)
    return pl.pallas_call(
        kernel,
        grid=(batch, ng, qt),
        in_specs=[pl.BlockSpec((tq, gd), lambda b, hg, qi: (b * qt + qi, hg)),
                  pl.BlockSpec((seq, gd), lambda b, hg, qi: (b, hg)),
                  pl.BlockSpec((seq, gd), lambda b, hg, qi: (b, hg))],
        out_specs=pl.BlockSpec((tq, gd), lambda b, hg, qi: (b * qt + qi, hg)),
        out_shape=jax.ShapeDtypeStruct((M, H), BF16),
        compiler_params=_cparams(("parallel", "parallel", "parallel")),
    )(q, k, v)


# ----------------------------------------------------------------------------
# classification head: max over the last-4 hidden states' sequence positions
# (== max_pool2d over torch.cat(h9..h12, dim=1)) fused with the classifier,
# in a single grid step — no serial per-batch grid, no (B, 4S, H) concat.
# ----------------------------------------------------------------------------
def _head_kernel(h9_ref, h10_ref, h11_ref, h12_ref, w_ref, b_ref, o_ref, *, batch):
    rows = []
    for bb in range(batch):
        p = jnp.max(h9_ref[bb].astype(F32), axis=0, keepdims=True)
        p = jnp.maximum(p, jnp.max(h10_ref[bb].astype(F32), axis=0, keepdims=True))
        p = jnp.maximum(p, jnp.max(h11_ref[bb].astype(F32), axis=0, keepdims=True))
        p = jnp.maximum(p, jnp.max(h12_ref[bb].astype(F32), axis=0, keepdims=True))
        rows.append(p)
    pooled = rows[0] if batch == 1 else jnp.concatenate(rows, axis=0)     # (B, H)
    logits = jnp.dot(pooled, w_ref[...].astype(F32), preferred_element_type=F32)
    o_ref[...] = logits + b_ref[...].astype(F32)


def classifier_head(h9, h10, h11, h12, w, b):
    # TODO(synk): for very large B*S*H the pooling should become a row-tiled kernel.
    B, S, H = h9.shape
    NL = w.shape[1]
    hspec = pl.BlockSpec((B, S, H), lambda i: (0, 0, 0))
    kernel = functools.partial(_head_kernel, batch=B)
    return pl.pallas_call(
        kernel,
        grid=(1,),
        in_specs=[hspec, hspec, hspec, hspec,
                  pl.BlockSpec((H, NL), lambda i: (0, 0)),
                  pl.BlockSpec((1, NL), lambda i: (0, 0))],
        out_specs=pl.BlockSpec((B, NL), lambda i: (0, 0)),
        out_shape=jax.ShapeDtypeStruct((B, NL), F32),
        compiler_params=_cparams(("arbitrary",)),
    )(h9, h10, h11, h12, w, b.reshape(1, NL))


# ----------------------------------------------------------------------------
# deterministic synthetic "BERT" parameters (12 layers -> hidden_states has 13
# entries, matching hidden_states[9..12] in the reference module)
# ----------------------------------------------------------------------------
def init_params(key, *, vocab, max_pos, type_vocab, hidden, inter, layers, labels):
    keys = iter(jax.random.split(key, 8 + 16 * layers))

    def nrm(shape):
        return (0.02 * jax.random.normal(next(keys), shape, F32)).astype(BF16)

    params = {
        "word_emb": nrm((vocab, hidden)),
        "pos_emb": nrm((max_pos, hidden)),
        "type_emb": nrm((type_vocab, hidden)),
        "emb_ln_g": jnp.ones((hidden,), BF16),
        "emb_ln_b": jnp.zeros((hidden,), BF16),
        "cls_w": nrm((hidden, labels)),
        "cls_b": jnp.zeros((labels,), BF16),
        "layers": [],
    }
    for _ in range(layers):
        params["layers"].append({
            "wq": nrm((hidden, hidden)), "bq": jnp.zeros((hidden,), BF16),
            "wk": nrm((hidden, hidden)), "bk": jnp.zeros((hidden,), BF16),
            "wv": nrm((hidden, hidden)), "bv": jnp.zeros((hidden,), BF16),
            "ao_w": nrm((hidden, hidden)), "ao_b": jnp.zeros((hidden,), BF16),
            "ln1_g": jnp.ones((hidden,), BF16), "ln1_b": jnp.zeros((hidden,), BF16),
            "ff1_w": nrm((hidden, inter)), "ff1_b": jnp.zeros((inter,), BF16),
            "ff2_w": nrm((inter, hidden)), "ff2_b": jnp.zeros((hidden,), BF16),
            "ln2_g": jnp.ones((hidden,), BF16), "ln2_b": jnp.zeros((hidden,), BF16),
        })
    return params


# ----------------------------------------------------------------------------
# forward pass (== bert_lr_last4layer.forward, labels=None, inference mode)
# ----------------------------------------------------------------------------
def bert_lr_last4layer_forward(params, input_ids, token_type_ids=None, *, num_heads):
    B, S = input_ids.shape
    H = params["word_emb"].shape[1]
    dh = H // num_heads
    M = B * S
    if token_type_ids is None:
        token_type_ids = jnp.zeros_like(input_ids)

    # embeddings: gathers + add are glue (XLA); LayerNorm in Pallas.
    emb = (params["word_emb"][input_ids]
           + params["pos_emb"][jnp.arange(S)][None, :, :]
           + params["type_emb"][token_type_ids]).astype(BF16)
    x = embedding_layernorm(emb.reshape(M, H), params["emb_ln_g"], params["emb_ln_b"])

    hidden_states = [x.reshape(B, S, H)]
    scale = 1.0 / float(dh) ** 0.5

    for lp in params["layers"]:
        # Q/K/V projection: one pass over x, three lane-dense (M, H) outputs
        # consumed directly by attention (no head-split/merge transposes).
        q, k, v = qkv_dense(x, lp["wq"], lp["bq"], lp["wk"], lp["bk"],
                            lp["wv"], lp["bv"])

        ctx = attention(q, k, v, batch=B, seq=S, num_heads=num_heads, scale=scale)

        # attention output projection with fused residual + LayerNorm epilogue
        x = dense_res_ln(ctx, lp["ao_w"], lp["ao_b"], x, lp["ln1_g"], lp["ln1_b"])

        # fused FFN (matmul + bias + GELU + matmul + bias + residual + LayerNorm)
        x = ffn(x, lp["ff1_w"], lp["ff1_b"], lp["ff2_w"], lp["ff2_b"],
                lp["ln2_g"], lp["ln2_b"])

        hidden_states.append(x.reshape(B, S, H))

    # head: max over last-4 layers' sequence positions + classifier
    # (dropout_bertout is identity at inference time)
    logits = classifier_head(hidden_states[9], hidden_states[10],
                             hidden_states[11], hidden_states[12],
                             params["cls_w"], params["cls_b"])
    # TODO(synk): CrossEntropy/MSE loss branch omitted (labels=None path).
    return logits


if __name__ == "__main__":
    B, S, H, NH, INTER, LAYERS, VOCAB, NUM_LABELS = 2, 8, 32, 4, 64, 12, 100, 3
    key = jax.random.PRNGKey(0)
    pkey, ikey = jax.random.split(key)
    params = init_params(pkey, vocab=VOCAB, max_pos=16, type_vocab=2,
                         hidden=H, inter=INTER, layers=LAYERS, labels=NUM_LABELS)
    input_ids = jax.random.randint(ikey, (B, S), 0, VOCAB)

    fwd = jax.jit(functools.partial(bert_lr_last4layer_forward, num_heads=NH))
    logits = fwd(params, input_ids)
    jax.block_until_ready(logits)
    assert logits.shape == (B, NUM_LABELS) and logits.dtype == F32
    print("KERNEL_OK")
</pallas_src>

<mosaic_0001>
module attributes {stable_mosaic.version = 11 : i64} {
  func.func @_attn_kernel(%arg0: i32, %arg1: i32, %arg2: i32, %arg3: memref<8x32xbf16, #tpu.memory_space<vmem>>, %arg4: memref<8x32xbf16, #tpu.memory_space<vmem>>, %arg5: memref<8x32xbf16, #tpu.memory_space<vmem>>, %arg6: memref<8x32xbf16, #tpu.memory_space<vmem>>) attributes {dimension_semantics = [#tpu.dimension_semantics<parallel>, #tpu.dimension_semantics<parallel>, #tpu.dimension_semantics<parallel>], iteration_bounds = array<i64: 2, 1, 1>, scalar_prefetch = 0 : i64, scratch_operands = 0 : i64, tpu.core_type = #tpu.core_type<tc>, window_params = [{transform_indices = @transform_0, window_bounds = array<i64: 8, 32>}, {transform_indices = @transform_1, window_bounds = array<i64: 8, 32>}, {transform_indices = @transform_2, window_bounds = array<i64: 8, 32>}, {transform_indices = @transform_3, window_bounds = array<i64: 8, 32>}]} {
    %c0 = arith.constant 0 : index
    %c0_0 = arith.constant 0 : index
    %0 = vector.load %arg3[%c0, %c0_0] : memref<8x32xbf16, #tpu.memory_space<vmem>>, vector<8x32xbf16>
    %c0_1 = arith.constant 0 : index
    %c0_2 = arith.constant 0 : index
    %1 = vector.load %arg4[%c0_1, %c0_2] : memref<8x32xbf16, #tpu.memory_space<vmem>>, vector<8x32xbf16>
    %c0_3 = arith.constant 0 : index
    %c0_4 = arith.constant 0 : index
    %2 = vector.load %arg5[%c0_3, %c0_4] : memref<8x32xbf16, #tpu.memory_space<vmem>>, vector<8x32xbf16>
    %3 = vector.extract_strided_slice %0 {offsets = [0, 0], sizes = [8, 8], strides = [1, 1]} : vector<8x32xbf16> to vector<8x8xbf16>
    %4 = vector.extract_strided_slice %1 {offsets = [0, 0], sizes = [8, 8], strides = [1, 1]} : vector<8x32xbf16> to vector<8x8xbf16>
    %5 = vector.extract_strided_slice %2 {offsets = [0, 0], sizes = [8, 8], strides = [1, 1]} : vector<8x32xbf16> to vector<8x8xbf16>
    %cst = arith.constant dense<0.000000e+00> : vector<8x8xf32>
    %6 = tpu.matmul %3, %4, %cst {dimension_numbers = #tpu.dot_dimension_numbers<[1], [1], [0], [0], [0, 0, 1, 0], [], []>} : vector<8x8xbf16>, vector<8x8xbf16>, vector<8x8xf32> -> vector<8x8xf32>
    %cst_5 = arith.constant 0.353553385 : f32
    %7 = vector.broadcast %cst_5 : f32 to vector<8x8xf32>
    %8 = arith.mulf %6, %7 : vector<8x8xf32>
    %cst_6 = arith.constant dense<0xFF800000> : vector<8xf32>
    %9 = vector.multi_reduction <maximumf>, %8, %cst_6 [1] : vector<8x8xf32> to vector<8xf32>
    %10 = vector.shape_cast %9 : vector<8xf32> to vector<8x1xf32>
    %11 = vector.broadcast %10 : vector<8x1xf32> to vector<8x8xf32>
    %12 = arith.subf %8, %11 : vector<8x8xf32>
    %13 = math.exp %12 : vector<8x8xf32>
    %cst_7 = arith.constant dense<0.000000e+00> : vector<8xf32>
    %14 = vector.multi_reduction <add>, %13, %cst_7 [1] : vector<8x8xf32> to vector<8xf32>
    %15 = vector.shape_cast %14 : vector<8xf32> to vector<8x1xf32>
    %16 = arith.truncf %13 : vector<8x8xf32> to vector<8x8xbf16>
    %cst_8 = arith.constant dense<0.000000e+00> : vector<8x8xf32>
    %17 = tpu.matmul %16, %5, %cst_8 {dimension_numbers = #tpu.dot_dimension_numbers<[1], [0], [0], [1], [0, 0, 1, 1], [], []>} : vector<8x8xbf16>, vector<8x8xbf16>, vector<8x8xf32> -> vector<8x8xf32>
    %18 = tpu.reciprocal %15 {approx = true} : vector<8x1xf32> -> vector<8x1xf32>
    %19 = vector.broadcast %18 : vector<8x1xf32> to vector<8x8xf32>
    %20 = arith.mulf %17, %19 : vector<8x8xf32>
    %21 = vector.extract_strided_slice %0 {offsets = [0, 8], sizes = [8, 8], strides = [1, 1]} : vector<8x32xbf16> to vector<8x8xbf16>
    %22 = vector.extract_strided_slice %1 {offsets = [0, 8], sizes = [8, 8], strides = [1, 1]} : vector<8x32xbf16> to vector<8x8xbf16>
    %23 = vector.extract_strided_slice %2 {offsets = [0, 8], sizes = [8, 8], strides = [1, 1]} : vector<8x32xbf16> to vector<8x8xbf16>
    %cst_9 = arith.constant dense<0.000000e+00> : vector<8x8xf32>
    %24 = tpu.matmul %21, %22, %cst_9 {dimension_numbers = #tpu.dot_dimension_numbers<[1], [1], [0], [0], [0, 0, 1, 0], [], []>} : vector<8x8xbf16>, vector<8x8xbf16>, vector<8x8xf32> -> vector<8x8xf32>
    %cst_10 = arith.constant 0.353553385 : f32
    %25 = vector.broadcast %cst_10 : f32 to vector<8x8xf32>
    %26 = arith.mulf %24, %25 : vector<8x8xf32>
    %cst_11 = arith.constant dense<0xFF800000> : vector<8xf32>
    %27 = vector.multi_reduction <maximumf>, %26, %cst_11 [1] : vector<8x8xf32> to vector<8xf32>
    %28 = vector.shape_cast %27 : vector<8xf32> to vector<8x1xf32>
    %29 = vector.broadcast %28 : vector<8x1xf32> to vector<8x8xf32>
    %30 = arith.subf %26, %29 : vector<8x8xf32>
    %31 = math.exp %30 : vector<8x8xf32>
    %cst_12 = arith.constant dense<0.000000e+00> : vector<8xf32>
    %32 = vector.multi_reduction <add>, %31, %cst_12 [1] : vector<8x8xf32> to vector<8xf32>
    %33 = vector.shape_cast %32 : vector<8xf32> to vector<8x1xf32>
    %34 = arith.truncf %31 : vector<8x8xf32> to vector<8x8xbf16>
    %cst_13 = arith.constant dense<0.000000e+00> : vector<8x8xf32>
    %35 = tpu.matmul %34, %23, %cst_13 {dimension_numbers = #tpu.dot_dimension_numbers<[1], [0], [0], [1], [0, 0, 1, 1], [], []>} : vector<8x8xbf16>, vector<8x8xbf16>, vector<8x8xf32> -> vector<8x8xf32>
    %36 = tpu.reciprocal %33 {approx = true} : vector<8x1xf32> -> vector<8x1xf32>
    %37 = vector.broadcast %36 : vector<8x1xf32> to vector<8x8xf32>
    %38 = arith.mulf %35, %37 : vector<8x8xf32>
    %39 = vector.extract_strided_slice %0 {offsets = [0, 16], sizes = [8, 8], strides = [1, 1]} : vector<8x32xbf16> to vector<8x8xbf16>
    %40 = vector.extract_strided_slice %1 {offsets = [0, 16], sizes = [8, 8], strides = [1, 1]} : vector<8x32xbf16> to vector<8x8xbf16>
    %41 = vector.extract_strided_slice %2 {offsets = [0, 16], sizes = [8, 8], strides = [1, 1]} : vector<8x32xbf16> to vector<8x8xbf16>
    %cst_14 = arith.constant dense<0.000000e+00> : vector<8x8xf32>
    %42 = tpu.matmul %39, %40, %cst_14 {dimension_numbers = #tpu.dot_dimension_numbers<[1], [1], [0], [0], [0, 0, 1, 0], [], []>} : vector<8x8xbf16>, vector<8x8xbf16>, vector<8x8xf32> -> vector<8x8xf32>
    %cst_15 = arith.constant 0.353553385 : f32
    %43 = vector.broadcast %cst_15 : f32 to vector<8x8xf32>
    %44 = arith.mulf %42, %43 : vector<8x8xf32>
    %cst_16 = arith.constant dense<0xFF800000> : vector<8xf32>
    %45 = vector.multi_reduction <maximumf>, %44, %cst_16 [1] : vector<8x8xf32> to vector<8xf32>
    %46 = vector.shape_cast %45 : vector<8xf32> to vector<8x1xf32>
    %47 = vector.broadcast %46 : vector<8x1xf32> to vector<8x8xf32>
    %48 = arith.subf %44, %47 : vector<8x8xf32>
    %49 = math.exp %48 : vector<8x8xf32>
    %cst_17 = arith.constant dense<0.000000e+00> : vector<8xf32>
    %50 = vector.multi_reduction <add>, %49, %cst_17 [1] : vector<8x8xf32> to vector<8xf32>
    %51 = vector.shape_cast %50 : vector<8xf32> to vector<8x1xf32>
    %52 = arith.truncf %49 : vector<8x8xf32> to vector<8x8xbf16>
    %cst_18 = arith.constant dense<0.000000e+00> : vector<8x8xf32>
    %53 = tpu.matmul %52, %41, %cst_18 {dimension_numbers = #tpu.dot_dimension_numbers<[1], [0], [0], [1], [0, 0, 1, 1], [], []>} : vector<8x8xbf16>, vector<8x8xbf16>, vector<8x8xf32> -> vector<8x8xf32>
    %54 = tpu.reciprocal %51 {approx = true} : vector<8x1xf32> -> vector<8x1xf32>
    %55 = vector.broadcast %54 : vector<8x1xf32> to vector<8x8xf32>
    %56 = arith.mulf %53, %55 : vector<8x8xf32>
    %57 = vector.extract_strided_slice %0 {offsets = [0, 24], sizes = [8, 8], strides = [1, 1]} : vector<8x32xbf16> to vector<8x8xbf16>
    %58 = vector.extract_strided_slice %1 {offsets = [0, 24], sizes = [8, 8], strides = [1, 1]} : vector<8x32xbf16> to vector<8x8xbf16>
    %59 = vector.extract_strided_slice %2 {offsets = [0, 24], sizes = [8, 8], strides = [1, 1]} : vector<8x32xbf16> to vector<8x8xbf16>
    %cst_19 = arith.constant dense<0.000000e+00> : vector<8x8xf32>
    %60 = tpu.matmul %57, %58, %cst_19 {dimension_numbers = #tpu.dot_dimension_numbers<[1], [1], [0], [0], [0, 0, 1, 0], [], []>} : vector<8x8xbf16>, vector<8x8xbf16>, vector<8x8xf32> -> vector<8x8xf32>
    %cst_20 = arith.constant 0.353553385 : f32
    %61 = vector.broadcast %cst_20 : f32 to vector<8x8xf32>
    %62 = arith.mulf %60, %61 : vector<8x8xf32>
    %cst_21 = arith.constant dense<0xFF800000> : vector<8xf32>
    %63 = vector.multi_reduction <maximumf>, %62, %cst_21 [1] : vector<8x8xf32> to vector<8xf32>
    %64 = vector.shape_cast %63 : vector<8xf32> to vector<8x1xf32>
    %65 = vector.broadcast %64 : vector<8x1xf32> to vector<8x8xf32>
    %66 = arith.subf %62, %65 : vector<8x8xf32>
    %67 = math.exp %66 : vector<8x8xf32>
    %cst_22 = arith.constant dense<0.000000e+00> : vector<8xf32>
    %68 = vector.multi_reduction <add>, %67, %cst_22 [1] : vector<8x8xf32> to vector<8xf32>
    %69 = vector.shape_cast %68 : vector<8xf32> to vector<8x1xf32>
    %70 = arith.truncf %67 : vector<8x8xf32> to vector<8x8xbf16>
    %cst_23 = arith.constant dense<0.000000e+00> : vector<8x8xf32>
    %71 = tpu.matmul %70, %59, %cst_23 {dimension_numbers = #tpu.dot_dimension_numbers<[1], [0], [0], [1], [0, 0, 1, 1], [], []>} : vector<8x8xbf16>, vector<8x8xbf16>, vector<8x8xf32> -> vector<8x8xf32>
    %72 = tpu.reciprocal %69 {approx = true} : vector<8x1xf32> -> vector<8x1xf32>
    %73 = vector.broadcast %72 : vector<8x1xf32> to vector<8x8xf32>
    %74 = arith.mulf %71, %73 : vector<8x8xf32>
    %75 = tpu.concatenate %20, %38, %56, %74 in 1 : vector<8x8xf32>, vector<8x8xf32>, vector<8x8xf32>, vector<8x8xf32> -> vector<8x32xf32>
    %76 = arith.truncf %75 : vector<8x32xf32> to vector<8x32xbf16>
    %c0_24 = arith.constant 0 : index
    %c0_25 = arith.constant 0 : index
    %77 = vector.load %arg6[%c0_24, %c0_25] : memref<8x32xbf16, #tpu.memory_space<vmem>>, vector<8x32xbf16>
    tpu.vector_store %arg6[%c0_24, %c0_25], %76 {strides = array<i32>} : memref<8x32xbf16, #tpu.memory_space<vmem>>, vector<8x32xbf16>,
    return
  }
  func.func @transform_0(%arg0: i32, %arg1: i32, %arg2: i32) -> (i32, i32) {
    %c1_i32 = arith.constant 1 : i32
    %0 = arith.muli %arg0, %c1_i32 : i32
    %1 = arith.addi %0, %arg2 : i32
    %c0_i32 = arith.constant 0 : i32
    return %1, %arg1 : i32, i32
  }
  func.func @transform_1(%arg0: i32, %arg1: i32, %arg2: i32) -> (i32, i32) {
    %c0_i32 = arith.constant 0 : i32
    return %arg0, %arg1 : i32, i32
  }
  func.func @transform_2(%arg0: i32, %arg1: i32, %arg2: i32) -> (i32, i32) {
    %c0_i32 = arith.constant 0 : i32
    return %arg0, %arg1 : i32, i32
  }
  func.func @transform_3(%arg0: i32, %arg1: i32, %arg2: i32) -> (i32, i32) {
    %c1_i32 = arith.constant 1 : i32
    %0 = arith.muli %arg0, %c1_i32 : i32
    %1 = arith.addi %0, %arg2 : i32
    %c0_i32 = arith.constant 0 : i32
    return %1, %arg1 : i32, i32
  }
}

module attributes {stable_mosaic.version = 11 : i64} {
  func.func @_qkv_kernel(%arg0: i32, %arg1: memref<16x32xbf16, #tpu.memory_space<vmem>>, %arg2: memref<32x32xbf16, #tpu.memory_space<vmem>>, %arg3: memref<32x32xbf16, #tpu.memory_space<vmem>>, %arg4: memref<32x32xbf16, #tpu.memory_space<vmem>>, %arg5: memref<1x32xbf16, #tpu.memory_space<vmem>>, %arg6: memref<1x32xbf16, #tpu.memory_space<vmem>>, %arg7: memref<1x32xbf16, #tpu.memory_space<vmem>>, %arg8: memref<16x32xbf16, #tpu.memory_space<vmem>>, %arg9: memref<16x32xbf16, #tpu.memory_space<vmem>>, %arg10: memref<16x32xbf16, #tpu.memory_space<vmem>>) attributes {dimension_semantics = [#tpu.dimension_semantics<parallel>], iteration_bounds = array<i64: 1>, scalar_prefetch = 0 : i64, scratch_operands = 0 : i64, tpu.core_type = #tpu.core_type<tc>, window_params = [{transform_indices = @transform_0, window_bounds = array<i64: 16, 32>}, {pipeline_mode = #tpu.pipeline_mode<synchronous>, transform_indices = @transform_1, window_bounds = array<i64: 32, 32>}, {pipeline_mode = #tpu.pipeline_mode<synchronous>, transform_indices = @transform_2, window_bounds = array<i64: 32, 32>}, {pipeline_mode = #tpu.pipeline_mode<synchronous>, transform_indices = @transform_3, window_bounds = array<i64: 32, 32>}, {pipeline_mode = #tpu.pipeline_mode<synchronous>, transform_indices = @transform_4, window_bounds = array<i64: 1, 32>}, {pipeline_mode = #tpu.pipeline_mode<synchronous>, transform_indices = @transform_5, window_bounds = array<i64: 1, 32>}, {pipeline_mode = #tpu.pipeline_mode<synchronous>, transform_indices = @transform_6, window_bounds = array<i64: 1, 32>}, {transform_indices = @transform_7, window_bounds = array<i64: 16, 32>}, {transform_indices = @transform_8, window_bounds = array<i64: 16, 32>}, {transform_indices = @transform_9, window_bounds = array<i64: 16, 32>}]} {
    %c0 = arith.constant 0 : index
    %c0_0 = arith.constant 0 : index
    %0 = vector.load %arg1[%c0, %c0_0] : memref<16x32xbf16, #tpu.memory_space<vmem>>, vector<16x32xbf16>
    %c0_1 = arith.constant 0 : index
    %c0_2 = arith.constant 0 : index
    %1 = vector.load %arg2[%c0_1, %c0_2] : memref<32x32xbf16, #tpu.memory_space<vmem>>, vector<32x32xbf16>
    %cst = arith.constant dense<0.000000e+00> : vector<16x32xf32>
    %2 = tpu.matmul %0, %1, %cst {dimension_numbers = #tpu.dot_dimension_numbers<[1], [0], [0], [1], [0, 0, 1, 1], [], []>} : vector<16x32xbf16>, vector<32x32xbf16>, vector<16x32xf32> -> vector<16x32xf32>
    %c0_3 = arith.constant 0 : index
    %c0_4 = arith.constant 0 : index
    %3 = vector.load %arg5[%c0_3, %c0_4] : memref<1x32xbf16, #tpu.memory_space<vmem>>, vector<1x32xbf16>
    %4 = arith.extf %3 : vector<1x32xbf16> to vector<1x32xf32>
    %5 = vector.broadcast %4 : vector<1x32xf32> to vector<16x32xf32>
    %6 = arith.addf %2, %5 : vector<16x32xf32>
    %7 = arith.truncf %6 : vector<16x32xf32> to vector<16x32xbf16>
    %c0_5 = arith.constant 0 : index
    %c0_6 = arith.constant 0 : index
    %8 = vector.load %arg8[%c0_5, %c0_6] : memref<16x32xbf16, #tpu.memory_space<vmem>>, vector<16x32xbf16>
    tpu.vector_store %arg8[%c0_5, %c0_6], %7 {strides = array<i32>} : memref<16x32xbf16, #tpu.memory_space<vmem>>, vector<16x32xbf16>,
    %c0_7 = arith.constant 0 : index
    %c0_8 = arith.constant 0 : index
    %9 = vector.load %arg3[%c0_7, %c0_8] : memref<32x32xbf16, #tpu.memory_space<vmem>>, vector<32x32xbf16>
    %cst_9 = arith.constant dense<0.000000e+00> : vector<16x32xf32>
    %10 = tpu.matmul %0, %9, %cst_9 {dimension_numbers = #tpu.dot_dimension_numbers<[1], [0], [0], [1], [0, 0, 1, 1], [], []>} : vector<16x32xbf16>, vector<32x32xbf16>, vector<16x32xf32> -> vector<16x32xf32>
    %c0_10 = arith.constant 0 : index
    %c0_11 = arith.constant 0 : index
    %11 = vector.load %arg6[%c0_10, %c0_11] : memref<1x32xbf16, #tpu.memory_space<vmem>>, vector<1x32xbf16>
    %12 = arith.extf %11 : vector<1x32xbf16> to vector<1x32xf32>
    %13 = vector.broadcast %12 : vector<1x32xf32> to vector<16x32xf32>
    %14 = arith.addf %10, %13 : vector<16x32xf32>
    %15 = arith.truncf %14 : vector<16x32xf32> to vector<16x32xbf16>
    %c0_12 = arith.constant 0 : index
    %c0_13 = arith.constant 0 : index
    %16 = vector.load %arg9[%c0_12, %c0_13] : memref<16x32xbf16, #tpu.memory_space<vmem>>, vector<16x32xbf16>
    tpu.vector_store %arg9[%c0_12, %c0_13], %15 {strides = array<i32>} : memref<16x32xbf16, #tpu.memory_space<vmem>>, vector<16x32xbf16>,
    %c0_14 = arith.constant 0 : index
    %c0_15 = arith.constant 0 : index
    %17 = vector.load %arg4[%c0_14, %c0_15] : memref<32x32xbf16, #tpu.memory_space<vmem>>, vector<32x32xbf16>
    %cst_16 = arith.constant dense<0.000000e+00> : vector<16x32xf32>
    %18 = tpu.matmul %0, %17, %cst_16 {dimension_numbers = #tpu.dot_dimension_numbers<[1], [0], [0], [1], [0, 0, 1, 1], [], []>} : vector<16x32xbf16>, vector<32x32xbf16>, vector<16x32xf32> -> vector<16x32xf32>
    %c0_17 = arith.constant 0 : index
    %c0_18 = arith.constant 0 : index
    %19 = vector.load %arg7[%c0_17, %c0_18] : memref<1x32xbf16, #tpu.memory_space<vmem>>, vector<1x32xbf16>
    %20 = arith.extf %19 : vector<1x32xbf16> to vector<1x32xf32>
    %21 = vector.broadcast %20 : vector<1x32xf32> to vector<16x32xf32>
    %22 = arith.addf %18, %21 : vector<16x32xf32>
    %23 = arith.truncf %22 : vector<16x32xf32> to vector<16x32xbf16>
    %c0_19 = arith.constant 0 : index
    %c0_20 = arith.constant 0 : index
    %24 = vector.load %arg10[%c0_19, %c0_20] : memref<16x32xbf16, #tpu.memory_space<vmem>>, vector<16x32xbf16>
    tpu.vector_store %arg10[%c0_19, %c0_20], %23 {strides = array<i32>} : memref<16x32xbf16, #tpu.memory_space<vmem>>, vector<16x32xbf16>,
    return
  }
  func.func @transform_0(%arg0: i32) -> (i32, i32) {
    %c0_i32 = arith.constant 0 : i32
    %c0_i32_0 = arith.constant 0 : i32
    return %arg0, %c0_i32 : i32, i32
  }
  func.func @transform_1(%arg0: i32) -> (i32, i32) {
    %c0_i32 = arith.constant 0 : i32
    %c0_i32_0 = arith.constant 0 : i32
    %c0_i32_1 = arith.constant 0 : i32
    return %c0_i32, %c0_i32_0 : i32, i32
  }
  func.func @transform_2(%arg0: i32) -> (i32, i32) {
    %c0_i32 = arith.constant 0 : i32
    %c0_i32_0 = arith.constant 0 : i32
    %c0_i32_1 = arith.constant 0 : i32
    return %c0_i32, %c0_i32_0 : i32, i32
  }
  func.func @transform_3(%arg0: i32) -> (i32, i32) {
    %c0_i32 = arith.constant 0 : i32
    %c0_i32_0 = arith.constant 0 : i32
    %c0_i32_1 = arith.constant 0 : i32
    return %c0_i32, %c0_i32_0 : i32, i32
  }
  func.func @transform_4(%arg0: i32) -> (i32, i32) {
    %c0_i32 = arith.constant 0 : i32
    %c0_i32_0 = arith.constant 0 : i32
    %c0_i32_1 = arith.constant 0 : i32
    return %c0_i32, %c0_i32_0 : i32, i32
  }
  func.func @transform_5(%arg0: i32) -> (i32, i32) {
    %c0_i32 = arith.constant 0 : i32
    %c0_i32_0 = arith.constant 0 : i32
    %c0_i32_1 = arith.constant 0 : i32
    return %c0_i32, %c0_i32_0 : i32, i32
  }
  func.func @transform_6(%arg0: i32) -> (i32, i32) {
    %c0_i32 = arith.constant 0 : i32
    %c0_i32_0 = arith.constant 0 : i32
    %c0_i32_1 = arith.constant 0 : i32
    return %c0_i32, %c0_i32_0 : i32, i32
  }
  func.func @transform_7(%arg0: i32) -> (i32, i32) {
    %c0_i32 = arith.constant 0 : i32
    %c0_i32_0 = arith.constant 0 : i32
    return %arg0, %c0_i32 : i32, i32
  }
  func.func @transform_8(%arg0: i32) -> (i32, i32) {
    %c0_i32 = arith.constant 0 : i32
    %c0_i32_0 = arith.constant 0 : i32
    return %arg0, %c0_i32 : i32, i32
  }
  func.func @transform_9(%arg0: i32) -> (i32, i32) {
    %c0_i32 = arith.constant 0 : i32
    %c0_i32_0 = arith.constant 0 : i32
    return %arg0, %c0_i32 : i32, i32
  }
}

module attributes {stable_mosaic.version = 11 : i64} {
  func.func @_emb_ln_kernel(%arg0: i32, %arg1: memref<16x32xbf16, #tpu.memory_space<vmem>>, %arg2: memref<1x32xbf16, #tpu.memory_space<vmem>>, %arg3: memref<1x32xbf16, #tpu.memory_space<vmem>>, %arg4: memref<16x32xbf16, #tpu.memory_space<vmem>>) attributes {dimension_semantics = [#tpu.dimension_semantics<parallel>], iteration_bounds = array<i64: 1>, scalar_prefetch = 0 : i64, scratch_operands = 0 : i64, tpu.core_type = #tpu.core_type<tc>, window_params = [{transform_indices = @transform_0, window_bounds = array<i64: 16, 32>}, {pipeline_mode = #tpu.pipeline_mode<synchronous>, transform_indices = @transform_1, window_bounds = array<i64: 1, 32>}, {pipeline_mode = #tpu.pipeline_mode<synchronous>, transform_indices = @transform_2, window_bounds = array<i64: 1, 32>}, {transform_indices = @transform_3, window_bounds = array<i64: 16, 32>}]} {
    %c0 = arith.constant 0 : index
    %c0_0 = arith.constant 0 : index
    %0 = vector.load %arg1[%c0, %c0_0] : memref<16x32xbf16, #tpu.memory_space<vmem>>, vector<16x32xbf16>
    %1 = arith.extf %0 : vector<16x32xbf16> to vector<16x32xf32>
    %c0_1 = arith.constant 0 : index
    %c0_2 = arith.constant 0 : index
    %2 = vector.load %arg2[%c0_1, %c0_2] : memref<1x32xbf16, #tpu.memory_space<vmem>>, vector<1x32xbf16>
    %3 = arith.extf %2 : vector<1x32xbf16> to vector<1x32xf32>
    %c0_3 = arith.constant 0 : index
    %c0_4 = arith.constant 0 : index
    %4 = vector.load %arg3[%c0_3, %c0_4] : memref<1x32xbf16, #tpu.memory_space<vmem>>, vector<1x32xbf16>
    %5 = arith.extf %4 : vector<1x32xbf16> to vector<1x32xf32>
    %cst = arith.constant dense<0.000000e+00> : vector<16xf32>
    %6 = vector.multi_reduction <add>, %1, %cst [1] : vector<16x32xf32> to vector<16xf32>
    %7 = vector.shape_cast %6 : vector<16xf32> to vector<16x1xf32>
    %cst_5 = arith.constant 3.200000e+01 : f32
    %8 = vector.broadcast %cst_5 : f32 to vector<16x1xf32>
    %9 = arith.divf %7, %8 : vector<16x1xf32>
    %10 = vector.broadcast %9 : vector<16x1xf32> to vector<16x32xf32>
    %11 = arith.subf %1, %10 : vector<16x32xf32>
    %12 = arith.mulf %11, %11 : vector<16x32xf32>
    %cst_6 = arith.constant dense<0.000000e+00> : vector<16xf32>
    %13 = vector.multi_reduction <add>, %12, %cst_6 [1] : vector<16x32xf32> to vector<16xf32>
    %14 = vector.shape_cast %13 : vector<16xf32> to vector<16x1xf32>
    %cst_7 = arith.constant 3.200000e+01 : f32
    %15 = vector.broadcast %cst_7 : f32 to vector<16x1xf32>
    %16 = arith.divf %14, %15 : vector<16x1xf32>
    %17 = vector.broadcast %9 : vector<16x1xf32> to vector<16x32xf32>
    %18 = arith.subf %1, %17 : vector<16x32xf32>
    %cst_8 = arith.constant 9.99999996E-13 : f32
    %19 = vector.broadcast %cst_8 : f32 to vector<16x1xf32>
    %20 = arith.addf %16, %19 : vector<16x1xf32>
    %21 = math.rsqrt %20 : vector<16x1xf32>
    %22 = vector.broadcast %21 : vector<16x1xf32> to vector<16x32xf32>
    %23 = arith.mulf %18, %22 : vector<16x32xf32>
    %24 = vector.broadcast %3 : vector<1x32xf32> to vector<16x32xf32>
    %25 = arith.mulf %23, %24 : vector<16x32xf32>
    %26 = vector.broadcast %5 : vector<1x32xf32> to vector<16x32xf32>
    %27 = arith.addf %25, %26 : vector<16x32xf32>
    %28 = arith.truncf %27 : vector<16x32xf32> to vector<16x32xbf16>
    %c0_9 = arith.constant 0 : index
    %c0_10 = arith.constant 0 : index
    %29 = vector.load %arg4[%c0_9, %c0_10] : memref<16x32xbf16, #tpu.memory_space<vmem>>, vector<16x32xbf16>
    tpu.vector_store %arg4[%c0_9, %c0_10], %28 {strides = array<i32>} : memref<16x32xbf16, #tpu.memory_space<vmem>>, vector<16x32xbf16>,
    return
  }
  func.func @transform_0(%arg0: i32) -> (i32, i32) {
    %c0_i32 = arith.constant 0 : i32
    %c0_i32_0 = arith.constant 0 : i32
    return %arg0, %c0_i32 : i32, i32
  }
  func.func @transform_1(%arg0: i32) -> (i32, i32) {
    %c0_i32 = arith.constant 0 : i32
    %c0_i32_0 = arith.constant 0 : i32
    %c0_i32_1 = arith.constant 0 : i32
    return %c0_i32, %c0_i32_0 : i32, i32
  }
  func.func @transform_2(%arg0: i32) -> (i32, i32) {
    %c0_i32 = arith.constant 0 : i32
    %c0_i32_0 = arith.constant 0 : i32
    %c0_i32_1 = arith.constant 0 : i32
    return %c0_i32, %c0_i32_0 : i32, i32
  }
  func.func @transform_3(%arg0: i32) -> (i32, i32) {
    %c0_i32 = arith.constant 0 : i32
    %c0_i32_0 = arith.constant 0 : i32
    return %arg0, %c0_i32 : i32, i32
  }
}

module attributes {stable_mosaic.version = 11 : i64} {
  func.func @_dense_res_ln_kernel(%arg0: i32, %arg1: memref<16x32xbf16, #tpu.memory_space<vmem>>, %arg2: memref<32x32xbf16, #tpu.memory_space<vmem>>, %arg3: memref<1x32xbf16, #tpu.memory_space<vmem>>, %arg4: memref<16x32xbf16, #tpu.memory_space<vmem>>, %arg5: memref<1x32xbf16, #tpu.memory_space<vmem>>, %arg6: memref<1x32xbf16, #tpu.memory_space<vmem>>, %arg7: memref<16x32xbf16, #tpu.memory_space<vmem>>) attributes {dimension_semantics = [#tpu.dimension_semantics<parallel>], iteration_bounds = array<i64: 1>, scalar_prefetch = 0 : i64, scratch_operands = 0 : i64, tpu.core_type = #tpu.core_type<tc>, window_params = [{transform_indices = @transform_0, window_bounds = array<i64: 16, 32>}, {pipeline_mode = #tpu.pipeline_mode<synchronous>, transform_indices = @transform_1, window_bounds = array<i64: 32, 32>}, {pipeline_mode = #tpu.pipeline_mode<synchronous>, transform_indices = @transform_2, window_bounds = array<i64: 1, 32>}, {transform_indices = @transform_3, window_bounds = array<i64: 16, 32>}, {pipeline_mode = #tpu.pipeline_mode<synchronous>, transform_indices = @transform_4, window_bounds = array<i64: 1, 32>}, {pipeline_mode = #tpu.pipeline_mode<synchronous>, transform_indices = @transform_5, window_bounds = array<i64: 1, 32>}, {transform_indices = @transform_6, window_bounds = array<i64: 16, 32>}]} {
    %c0 = arith.constant 0 : index
    %c0_0 = arith.constant 0 : index
    %0 = vector.load %arg1[%c0, %c0_0] : memref<16x32xbf16, #tpu.memory_space<vmem>>, vector<16x32xbf16>
    %c0_1 = arith.constant 0 : index
    %c0_2 = arith.constant 0 : index
    %1 = vector.load %arg2[%c0_1, %c0_2] : memref<32x32xbf16, #tpu.memory_space<vmem>>, vector<32x32xbf16>
    %cst = arith.constant dense<0.000000e+00> : vector<16x32xf32>
    %2 = tpu.matmul %0, %1, %cst {dimension_numbers = #tpu.dot_dimension_numbers<[1], [0], [0], [1], [0, 0, 1, 1], [], []>} : vector<16x32xbf16>, vector<32x32xbf16>, vector<16x32xf32> -> vector<16x32xf32>
    %c0_3 = arith.constant 0 : index
    %c0_4 = arith.constant 0 : index
    %3 = vector.load %arg3[%c0_3, %c0_4] : memref<1x32xbf16, #tpu.memory_space<vmem>>, vector<1x32xbf16>
    %4 = arith.extf %3 : vector<1x32xbf16> to vector<1x32xf32>
    %5 = vector.broadcast %4 : vector<1x32xf32> to vector<16x32xf32>
    %6 = arith.addf %2, %5 : vector<16x32xf32>
    %c0_5 = arith.constant 0 : index
    %c0_6 = arith.constant 0 : index
    %7 = vector.load %arg4[%c0_5, %c0_6] : memref<16x32xbf16, #tpu.memory_space<vmem>>, vector<16x32xbf16>
    %8 = arith.extf %7 : vector<16x32xbf16> to vector<16x32xf32>
    %9 = arith.addf %6, %8 : vector<16x32xf32>
    %c0_7 = arith.constant 0 : index
    %c0_8 = arith.constant 0 : index
    %10 = vector.load %arg5[%c0_7, %c0_8] : memref<1x32xbf16, #tpu.memory_space<vmem>>, vector<1x32xbf16>
    %11 = arith.extf %10 : vector<1x32xbf16> to vector<1x32xf32>
    %c0_9 = arith.constant 0 : index
    %c0_10 = arith.constant 0 : index
    %12 = vector.load %arg6[%c0_9, %c0_10] : memref<1x32xbf16, #tpu.memory_space<vmem>>, vector<1x32xbf16>
    %13 = arith.extf %12 : vector<1x32xbf16> to vector<1x32xf32>
    %cst_11 = arith.constant dense<0.000000e+00> : vector<16xf32>
    %14 = vector.multi_reduction <add>, %9, %cst_11 [1] : vector<16x32xf32> to vector<16xf32>
    %15 = vector.shape_cast %14 : vector<16xf32> to vector<16x1xf32>
    %cst_12 = arith.constant 3.200000e+01 : f32
    %16 = vector.broadcast %cst_12 : f32 to vector<16x1xf32>
    %17 = arith.divf %15, %16 : vector<16x1xf32>
    %18 = vector.broadcast %17 : vector<16x1xf32> to vector<16x32xf32>
    %19 = arith.subf %9, %18 : vector<16x32xf32>
    %20 = arith.mulf %19, %19 : vector<16x32xf32>
    %cst_13 = arith.constant dense<0.000000e+00> : vector<16xf32>
    %21 = vector.multi_reduction <add>, %20, %cst_13 [1] : vector<16x32xf32> to vector<16xf32>
    %22 = vector.shape_cast %21 : vector<16xf32> to vector<16x1xf32>
    %cst_14 = arith.constant 3.200000e+01 : f32
    %23 = vector.broadcast %cst_14 : f32 to vector<16x1xf32>
    %24 = arith.divf %22, %23 : vector<16x1xf32>
    %25 = vector.broadcast %17 : vector<16x1xf32> to vector<16x32xf32>
    %26 = arith.subf %9, %25 : vector<16x32xf32>
    %cst_15 = arith.constant 9.99999996E-13 : f32
    %27 = vector.broadcast %cst_15 : f32 to vector<16x1xf32>
    %28 = arith.addf %24, %27 : vector<16x1xf32>
    %29 = math.rsqrt %28 : vector<16x1xf32>
    %30 = vector.broadcast %29 : vector<16x1xf32> to vector<16x32xf32>
    %31 = arith.mulf %26, %30 : vector<16x32xf32>
    %32 = vector.broadcast %11 : vector<1x32xf32> to vector<16x32xf32>
    %33 = arith.mulf %31, %32 : vector<16x32xf32>
    %34 = vector.broadcast %13 : vector<1x32xf32> to vector<16x32xf32>
    %35 = arith.addf %33, %34 : vector<16x32xf32>
    %36 = arith.truncf %35 : vector<16x32xf32> to vector<16x32xbf16>
    %c0_16 = arith.constant 0 : index
    %c0_17 = arith.constant 0 : index
    %37 = vector.load %arg7[%c0_16, %c0_17] : memref<16x32xbf16, #tpu.memory_space<vmem>>, vector<16x32xbf16>
    tpu.vector_store %arg7[%c0_16, %c0_17], %36 {strides = array<i32>} : memref<16x32xbf16, #tpu.memory_space<vmem>>, vector<16x32xbf16>,
    return
  }
  func.func @transform_0(%arg0: i32) -> (i32, i32) {
    %c0_i32 = arith.constant 0 : i32
    %c0_i32_0 = arith.constant 0 : i32
    return %arg0, %c0_i32 : i32, i32
  }
  func.func @transform_1(%arg0: i32) -> (i32, i32) {
    %c0_i32 = arith.constant 0 : i32
    %c0_i32_0 = arith.constant 0 : i32
    %c0_i32_1 = arith.constant 0 : i32
    return %c0_i32, %c0_i32_0 : i32, i32
  }
  func.func @transform_2(%arg0: i32) -> (i32, i32) {
    %c0_i32 = arith.constant 0 : i32
    %c0_i32_0 = arith.constant 0 : i32
    %c0_i32_1 = arith.constant 0 : i32
    return %c0_i32, %c0_i32_0 : i32, i32
  }
  func.func @transform_3(%arg0: i32) -> (i32, i32) {
    %c0_i32 = arith.constant 0 : i32
    %c0_i32_0 = arith.constant 0 : i32
    return %arg0, %c0_i32 : i32, i32
  }
  func.func @transform_4(%arg0: i32) -> (i32, i32) {
    %c0_i32 = arith.constant 0 : i32
    %c0_i32_0 = arith.constant 0 : i32
    %c0_i32_1 = arith.constant 0 : i32
    return %c0_i32, %c0_i32_0 : i32, i32
  }
  func.func @transform_5(%arg0: i32) -> (i32, i32) {
    %c0_i32 = arith.constant 0 : i32
    %c0_i32_0 = arith.constant 0 : i32
    %c0_i32_1 = arith.constant 0 : i32
    return %c0_i32, %c0_i32_0 : i32, i32
  }
  func.func @transform_6(%arg0: i32) -> (i32, i32) {
    %c0_i32 = arith.constant 0 : i32
    %c0_i32_0 = arith.constant 0 : i32
    return %arg0, %c0_i32 : i32, i32
  }
}

module attributes {stable_mosaic.version = 11 : i64} {
  func.func @_ffn_kernel(%arg0: i32, %arg1: memref<16x32xbf16, #tpu.memory_space<vmem>>, %arg2: memref<32x64xbf16, #tpu.memory_space<vmem>>, %arg3: memref<1x64xbf16, #tpu.memory_space<vmem>>, %arg4: memref<64x32xbf16, #tpu.memory_space<vmem>>, %arg5: memref<1x32xbf16, #tpu.memory_space<vmem>>, %arg6: memref<1x32xbf16, #tpu.memory_space<vmem>>, %arg7: memref<1x32xbf16, #tpu.memory_space<vmem>>, %arg8: memref<16x32xbf16, #tpu.memory_space<vmem>>) attributes {dimension_semantics = [#tpu.dimension_semantics<parallel>], iteration_bounds = array<i64: 1>, scalar_prefetch = 0 : i64, scratch_operands = 0 : i64, tpu.core_type = #tpu.core_type<tc>, window_params = [{transform_indices = @transform_0, window_bounds = array<i64: 16, 32>}, {pipeline_mode = #tpu.pipeline_mode<synchronous>, transform_indices = @transform_1, window_bounds = array<i64: 32, 64>}, {pipeline_mode = #tpu.pipeline_mode<synchronous>, transform_indices = @transform_2, window_bounds = array<i64: 1, 64>}, {pipeline_mode = #tpu.pipeline_mode<synchronous>, transform_indices = @transform_3, window_bounds = array<i64: 64, 32>}, {pipeline_mode = #tpu.pipeline_mode<synchronous>, transform_indices = @transform_4, window_bounds = array<i64: 1, 32>}, {pipeline_mode = #tpu.pipeline_mode<synchronous>, transform_indices = @transform_5, window_bounds = array<i64: 1, 32>}, {pipeline_mode = #tpu.pipeline_mode<synchronous>, transform_indices = @transform_6, window_bounds = array<i64: 1, 32>}, {transform_indices = @transform_7, window_bounds = array<i64: 16, 32>}]} {
    %c0 = arith.constant 0 : index
    %c0_0 = arith.constant 0 : index
    %0 = vector.load %arg1[%c0, %c0_0] : memref<16x32xbf16, #tpu.memory_space<vmem>>, vector<16x32xbf16>
    %c0_1 = arith.constant 0 : index
    %c0_2 = arith.constant 0 : index
    %1 = vector.load %arg2[%c0_1, %c0_2] : memref<32x64xbf16, #tpu.memory_space<vmem>>, vector<32x64xbf16>
    %cst = arith.constant dense<0.000000e+00> : vector<16x64xf32>
    %2 = tpu.matmul %0, %1, %cst {dimension_numbers = #tpu.dot_dimension_numbers<[1], [0], [0], [1], [0, 0, 1, 1], [], []>} : vector<16x32xbf16>, vector<32x64xbf16>, vector<16x64xf32> -> vector<16x64xf32>
    %c0_3 = arith.constant 0 : index
    %c0_4 = arith.constant 0 : index
    %3 = vector.load %arg3[%c0_3, %c0_4] : memref<1x64xbf16, #tpu.memory_space<vmem>>, vector<1x64xbf16>
    %4 = arith.extf %3 : vector<1x64xbf16> to vector<1x64xf32>
    %5 = vector.broadcast %4 : vector<1x64xf32> to vector<16x64xf32>
    %6 = arith.addf %2, %5 : vector<16x64xf32>
    %7 = arith.mulf %6, %6 : vector<16x64xf32>
    %8 = arith.mulf %6, %7 : vector<16x64xf32>
    %cst_5 = arith.constant 4.471500e-02 : f32
    %9 = vector.broadcast %cst_5 : f32 to vector<16x64xf32>
    %10 = arith.mulf %9, %8 : vector<16x64xf32>
    %11 = arith.addf %6, %10 : vector<16x64xf32>
    %cst_6 = arith.constant 0.797884583 : f32
    %12 = vector.broadcast %cst_6 : f32 to vector<16x64xf32>
    %13 = arith.mulf %12, %11 : vector<16x64xf32>
    %14 = math.tanh %13 : vector<16x64xf32>
    %cst_7 = arith.constant 1.000000e+00 : f32
    %15 = vector.broadcast %cst_7 : f32 to vector<16x64xf32>
    %16 = arith.addf %15, %14 : vector<16x64xf32>
    %cst_8 = arith.constant 5.000000e-01 : f32
    %17 = vector.broadcast %cst_8 : f32 to vector<16x64xf32>
    %18 = arith.mulf %17, %16 : vector<16x64xf32>
    %19 = arith.mulf %6, %18 : vector<16x64xf32>
    %20 = arith.truncf %19 : vector<16x64xf32> to vector<16x64xbf16>
    %c0_9 = arith.constant 0 : index
    %c0_10 = arith.constant 0 : index
    %21 = vector.load %arg4[%c0_9, %c0_10] : memref<64x32xbf16, #tpu.memory_space<vmem>>, vector<64x32xbf16>
    %cst_11 = arith.constant dense<0.000000e+00> : vector<16x32xf32>
    %22 = tpu.matmul %20, %21, %cst_11 {dimension_numbers = #tpu.dot_dimension_numbers<[1], [0], [0], [1], [0, 0, 1, 1], [], []>} : vector<16x64xbf16>, vector<64x32xbf16>, vector<16x32xf32> -> vector<16x32xf32>
    %c0_12 = arith.constant 0 : index
    %c0_13 = arith.constant 0 : index
    %23 = vector.load %arg5[%c0_12, %c0_13] : memref<1x32xbf16, #tpu.memory_space<vmem>>, vector<1x32xbf16>
    %24 = arith.extf %23 : vector<1x32xbf16> to vector<1x32xf32>
    %25 = vector.broadcast %24 : vector<1x32xf32> to vector<16x32xf32>
    %26 = arith.addf %22, %25 : vector<16x32xf32>
    %27 = arith.extf %0 : vector<16x32xbf16> to vector<16x32xf32>
    %28 = arith.addf %26, %27 : vector<16x32xf32>
    %c0_14 = arith.constant 0 : index
    %c0_15 = arith.constant 0 : index
    %29 = vector.load %arg6[%c0_14, %c0_15] : memref<1x32xbf16, #tpu.memory_space<vmem>>, vector<1x32xbf16>
    %30 = arith.extf %29 : vector<1x32xbf16> to vector<1x32xf32>
    %c0_16 = arith.constant 0 : index
    %c0_17 = arith.constant 0 : index
    %31 = vector.load %arg7[%c0_16, %c0_17] : memref<1x32xbf16, #tpu.memory_space<vmem>>, vector<1x32xbf16>
    %32 = arith.extf %31 : vector<1x32xbf16> to vector<1x32xf32>
    %cst_18 = arith.constant dense<0.000000e+00> : vector<16xf32>
    %33 = vector.multi_reduction <add>, %28, %cst_18 [1] : vector<16x32xf32> to vector<16xf32>
    %34 = vector.shape_cast %33 : vector<16xf32> to vector<16x1xf32>
    %cst_19 = arith.constant 3.200000e+01 : f32
    %35 = vector.broadcast %cst_19 : f32 to vector<16x1xf32>
    %36 = arith.divf %34, %35 : vector<16x1xf32>
    %37 = vector.broadcast %36 : vector<16x1xf32> to vector<16x32xf32>
    %38 = arith.subf %28, %37 : vector<16x32xf32>
    %39 = arith.mulf %38, %38 : vector<16x32xf32>
    %cst_20 = arith.constant dense<0.000000e+00> : vector<16xf32>
    %40 = vector.multi_reduction <add>, %39, %cst_20 [1] : vector<16x32xf32> to vector<16xf32>
    %41 = vector.shape_cast %40 : vector<16xf32> to vector<16x1xf32>
    %cst_21 = arith.constant 3.200000e+01 : f32
    %42 = vector.broadcast %cst_21 : f32 to vector<16x1xf32>
    %43 = arith.divf %41, %42 : vector<16x1xf32>
    %44 = vector.broadcast %36 : vector<16x1xf32> to vector<16x32xf32>
    %45 = arith.subf %28, %44 : vector<16x32xf32>
    %cst_22 = arith.constant 9.99999996E-13 : f32
    %46 = vector.broadcast %cst_22 : f32 to vector<16x1xf32>
    %47 = arith.addf %43, %46 : vector<16x1xf32>
    %48 = math.rsqrt %47 : vector<16x1xf32>
    %49 = vector.broadcast %48 : vector<16x1xf32> to vector<16x32xf32>
    %50 = arith.mulf %45, %49 : vector<16x32xf32>
    %51 = vector.broadcast %30 : vector<1x32xf32> to vector<16x32xf32>
    %52 = arith.mulf %50, %51 : vector<16x32xf32>
    %53 = vector.broadcast %32 : vector<1x32xf32> to vector<16x32xf32>
    %54 = arith.addf %52, %53 : vector<16x32xf32>
    %55 = arith.truncf %54 : vector<16x32xf32> to vector<16x32xbf16>
    %c0_23 = arith.constant 0 : index
    %c0_24 = arith.constant 0 : index
    %56 = vector.load %arg8[%c0_23, %c0_24] : memref<16x32xbf16, #tpu.memory_space<vmem>>, vector<16x32xbf16>
    tpu.vector_store %arg8[%c0_23, %c0_24], %55 {strides = array<i32>} : memref<16x32xbf16, #tpu.memory_space<vmem>>, vector<16x32xbf16>,
    return
  }
  func.func @transform_0(%arg0: i32) -> (i32, i32) {
    %c0_i32 = arith.constant 0 : i32
    %c0_i32_0 = arith.constant 0 : i32
    return %arg0, %c0_i32 : i32, i32
  }
  func.func @transform_1(%arg0: i32) -> (i32, i32) {
    %c0_i32 = arith.constant 0 : i32
    %c0_i32_0 = arith.constant 0 : i32
    %c0_i32_1 = arith.constant 0 : i32
    return %c0_i32, %c0_i32_0 : i32, i32
  }
  func.func @transform_2(%arg0: i32) -> (i32, i32) {
    %c0_i32 = arith.constant 0 : i32
    %c0_i32_0 = arith.constant 0 : i32
    %c0_i32_1 = arith.constant 0 : i32
    return %c0_i32, %c0_i32_0 : i32, i32
  }
  func.func @transform_3(%arg0: i32) -> (i32, i32) {
    %c0_i32 = arith.constant 0 : i32
    %c0_i32_0 = arith.constant 0 : i32
    %c0_i32_1 = arith.constant 0 : i32
    return %c0_i32, %c0_i32_0 : i32, i32
  }
  func.func @transform_4(%arg0: i32) -> (i32, i32) {
    %c0_i32 = arith.constant 0 : i32
    %c0_i32_0 = arith.constant 0 : i32
    %c0_i32_1 = arith.constant 0 : i32
    return %c0_i32, %c0_i32_0 : i32, i32
  }
  func.func @transform_5(%arg0: i32) -> (i32, i32) {
    %c0_i32 = arith.constant 0 : i32
    %c0_i32_0 = arith.constant 0 : i32
    %c0_i32_1 = arith.constant 0 : i32
    return %c0_i32, %c0_i32_0 : i32, i32
  }
  func.func @transform_6(%arg0: i32) -> (i32, i32) {
    %c0_i32 = arith.constant 0 : i32
    %c0_i32_0 = arith.constant 0 : i32
    %c0_i32_1 = arith.constant 0 : i32
    return %c0_i32, %c0_i32_0 : i32, i32
  }
  func.func @transform_7(%arg0: i32) -> (i32, i32) {
    %c0_i32 = arith.constant 0 : i32
    %c0_i32_0 = arith.constant 0 : i32
    return %arg0, %c0_i32 : i32, i32
  }
}

module attributes {stable_mosaic.version = 11 : i64} {
  func.func @_head_kernel(%arg0: i32, %arg1: memref<2x8x32xbf16, #tpu.memory_space<vmem>>, %arg2: memref<2x8x32xbf16, #tpu.memory_space<vmem>>, %arg3: memref<2x8x32xbf16, #tpu.memory_space<vmem>>, %arg4: memref<2x8x32xbf16, #tpu.memory_space<vmem>>, %arg5: memref<32x3xbf16, #tpu.memory_space<vmem>>, %arg6: memref<1x3xbf16, #tpu.memory_space<vmem>>, %arg7: memref<2x3xf32, #tpu.memory_space<vmem>>) attributes {dimension_semantics = [#tpu.dimension_semantics<arbitrary>], iteration_bounds = array<i64: 1>, scalar_prefetch = 0 : i64, scratch_operands = 0 : i64, tpu.core_type = #tpu.core_type<tc>, window_params = [{pipeline_mode = #tpu.pipeline_mode<synchronous>, transform_indices = @transform_0, window_bounds = array<i64: 2, 8, 32>}, {pipeline_mode = #tpu.pipeline_mode<synchronous>, transform_indices = @transform_1, window_bounds = array<i64: 2, 8, 32>}, {pipeline_mode = #tpu.pipeline_mode<synchronous>, transform_indices = @transform_2, window_bounds = array<i64: 2, 8, 32>}, {pipeline_mode = #tpu.pipeline_mode<synchronous>, transform_indices = @transform_3, window_bounds = array<i64: 2, 8, 32>}, {pipeline_mode = #tpu.pipeline_mode<synchronous>, transform_indices = @transform_4, window_bounds = array<i64: 32, 3>}, {pipeline_mode = #tpu.pipeline_mode<synchronous>, transform_indices = @transform_5, window_bounds = array<i64: 1, 3>}, {pipeline_mode = #tpu.pipeline_mode<synchronous>, transform_indices = @transform_6, window_bounds = array<i64: 2, 3>}]} {
    %c0 = arith.constant 0 : index
    %c0_0 = arith.constant 0 : index
    %c0_1 = arith.constant 0 : index
    %0 = vector.load %arg1[%c0, %c0_0, %c0_1] : memref<2x8x32xbf16, #tpu.memory_space<vmem>>, vector<1x8x32xbf16>
    %1 = vector.shape_cast %0 : vector<1x8x32xbf16> to vector<8x32xbf16>
    %2 = arith.extf %1 : vector<8x32xbf16> to vector<8x32xf32>
    %cst = arith.constant dense<0xFF800000> : vector<32xf32>
    %3 = vector.multi_reduction <maximumf>, %2, %cst [0] : vector<8x32xf32> to vector<32xf32>
    %4 = vector.shape_cast %3 : vector<32xf32> to vector<1x32xf32>
    %c0_2 = arith.constant 0 : index
    %c0_3 = arith.constant 0 : index
    %c0_4 = arith.constant 0 : index
    %5 = vector.load %arg2[%c0_2, %c0_3, %c0_4] : memref<2x8x32xbf16, #tpu.memory_space<vmem>>, vector<1x8x32xbf16>
    %6 = vector.shape_cast %5 : vector<1x8x32xbf16> to vector<8x32xbf16>
    %7 = arith.extf %6 : vector<8x32xbf16> to vector<8x32xf32>
    %cst_5 = arith.constant dense<0xFF800000> : vector<32xf32>
    %8 = vector.multi_reduction <maximumf>, %7, %cst_5 [0] : vector<8x32xf32> to vector<32xf32>
    %9 = vector.shape_cast %8 : vector<32xf32> to vector<1x32xf32>
    %10 = arith.maximumf %4, %9 : vector<1x32xf32>
    %c0_6 = arith.constant 0 : index
    %c0_7 = arith.constant 0 : index
    %c0_8 = arith.constant 0 : index
    %11 = vector.load %arg3[%c0_6, %c0_7, %c0_8] : memref<2x8x32xbf16, #tpu.memory_space<vmem>>, vector<1x8x32xbf16>
    %12 = vector.shape_cast %11 : vector<1x8x32xbf16> to vector<8x32xbf16>
    %13 = arith.extf %12 : vector<8x32xbf16> to vector<8x32xf32>
    %cst_9 = arith.constant dense<0xFF800000> : vector<32xf32>
    %14 = vector.multi_reduction <maximumf>, %13, %cst_9 [0] : vector<8x32xf32> to vector<32xf32>
    %15 = vector.shape_cast %14 : vector<32xf32> to vector<1x32xf32>
    %16 = arith.maximumf %10, %15 : vector<1x32xf32>
    %c0_10 = arith.constant 0 : index
    %c0_11 = arith.constant 0 : index
    %c0_12 = arith.constant 0 : index
    %17 = vector.load %arg4[%c0_10, %c0_11, %c0_12] : memref<2x8x32xbf16, #tpu.memory_space<vmem>>, vector<1x8x32xbf16>
    %18 = vector.shape_cast %17 : vector<1x8x32xbf16> to vector<8x32xbf16>
    %19 = arith.extf %18 : vector<8x32xbf16> to vector<8x32xf32>
    %cst_13 = arith.constant dense<0xFF800000> : vector<32xf32>
    %20 = vector.multi_reduction <maximumf>, %19, %cst_13 [0] : vector<8x32xf32> to vector<32xf32>
    %21 = vector.shape_cast %20 : vector<32xf32> to vector<1x32xf32>
    %22 = arith.maximumf %16, %21 : vector<1x32xf32>
    %c1 = arith.constant 1 : index
    %c0_14 = arith.constant 0 : index
    %c0_15 = arith.constant 0 : index
    %23 = vector.load %arg1[%c1, %c0_14, %c0_15] : memref<2x8x32xbf16, #tpu.memory_space<vmem>>, vector<1x8x32xbf16>
    %24 = vector.shape_cast %23 : vector<1x8x32xbf16> to vector<8x32xbf16>
    %25 = arith.extf %24 : vector<8x32xbf16> to vector<8x32xf32>
    %cst_16 = arith.constant dense<0xFF800000> : vector<32xf32>
    %26 = vector.multi_reduction <maximumf>, %25, %cst_16 [0] : vector<8x32xf32> to vector<32xf32>
    %27 = vector.shape_cast %26 : vector<32xf32> to vector<1x32xf32>
    %c1_17 = arith.constant 1 : index
    %c0_18 = arith.constant 0 : index
    %c0_19 = arith.constant 0 : index
    %28 = vector.load %arg2[%c1_17, %c0_18, %c0_19] : memref<2x8x32xbf16, #tpu.memory_space<vmem>>, vector<1x8x32xbf16>
    %29 = vector.shape_cast %28 : vector<1x8x32xbf16> to vector<8x32xbf16>
    %30 = arith.extf %29 : vector<8x32xbf16> to vector<8x32xf32>
    %cst_20 = arith.constant dense<0xFF800000> : vector<32xf32>
    %31 = vector.multi_reduction <maximumf>, %30, %cst_20 [0] : vector<8x32xf32> to vector<32xf32>
    %32 = vector.shape_cast %31 : vector<32xf32> to vector<1x32xf32>
    %33 = arith.maximumf %27, %32 : vector<1x32xf32>
    %c1_21 = arith.constant 1 : index
    %c0_22 = arith.constant 0 : index
    %c0_23 = arith.constant 0 : index
    %34 = vector.load %arg3[%c1_21, %c0_22, %c0_23] : memref<2x8x32xbf16, #tpu.memory_space<vmem>>, vector<1x8x32xbf16>
    %35 = vector.shape_cast %34 : vector<1x8x32xbf16> to vector<8x32xbf16>
    %36 = arith.extf %35 : vector<8x32xbf16> to vector<8x32xf32>
    %cst_24 = arith.constant dense<0xFF800000> : vector<32xf32>
    %37 = vector.multi_reduction <maximumf>, %36, %cst_24 [0] : vector<8x32xf32> to vector<32xf32>
    %38 = vector.shape_cast %37 : vector<32xf32> to vector<1x32xf32>
    %39 = arith.maximumf %33, %38 : vector<1x32xf32>
    %c1_25 = arith.constant 1 : index
    %c0_26 = arith.constant 0 : index
    %c0_27 = arith.constant 0 : index
    %40 = vector.load %arg4[%c1_25, %c0_26, %c0_27] : memref<2x8x32xbf16, #tpu.memory_space<vmem>>, vector<1x8x32xbf16>
    %41 = vector.shape_cast %40 : vector<1x8x32xbf16> to vector<8x32xbf16>
    %42 = arith.extf %41 : vector<8x32xbf16> to vector<8x32xf32>
    %cst_28 = arith.constant dense<0xFF800000> : vector<32xf32>
    %43 = vector.multi_reduction <maximumf>, %42, %cst_28 [0] : vector<8x32xf32> to vector<32xf32>
    %44 = vector.shape_cast %43 : vector<32xf32> to vector<1x32xf32>
    %45 = arith.maximumf %39, %44 : vector<1x32xf32>
    %46 = tpu.concatenate %22, %45 in 0 : vector<1x32xf32>, vector<1x32xf32> -> vector<2x32xf32>
    %c0_29 = arith.constant 0 : index
    %c0_30 = arith.constant 0 : index
    %47 = vector.load %arg5[%c0_29, %c0_30] : memref<32x3xbf16, #tpu.memory_space<vmem>>, vector<32x3xbf16>
    %48 = arith.extf %47 : vector<32x3xbf16> to vector<32x3xf32>
    %cst_31 = arith.constant dense<0.000000e+00> : vector<2x3xf32>
    %49 = tpu.matmul %46, %48, %cst_31 {dimension_numbers = #tpu.dot_dimension_numbers<[1], [0], [0], [1], [0, 0, 1, 1], [], []>} : vector<2x32xf32>, vector<32x3xf32>, vector<2x3xf32> -> vector<2x3xf32>
    %c0_32 = arith.constant 0 : index
    %c0_33 = arith.constant 0 : index
    %50 = vector.load %arg6[%c0_32, %c0_33] : memref<1x3xbf16, #tpu.memory_space<vmem>>, vector<1x3xbf16>
    %51 = arith.extf %50 : vector<1x3xbf16> to vector<1x3xf32>
    %52 = vector.broadcast %51 : vector<1x3xf32> to vector<2x3xf32>
    %53 = arith.addf %49, %52 : vector<2x3xf32>
    %c0_34 = arith.constant 0 : index
    %c0_35 = arith.constant 0 : index
    %54 = vector.load %arg7[%c0_34, %c0_35] : memref<2x3xf32, #tpu.memory_space<vmem>>, vector<2x3xf32>
    tpu.vector_store %arg7[%c0_34, %c0_35], %53 {strides = array<i32>} : memref<2x3xf32, #tpu.memory_space<vmem>>, vector<2x3xf32>,
    return
  }
  func.func @transform_0(%arg0: i32) -> (i32, i32, i32) {
    %c0_i32 = arith.constant 0 : i32
    %c0_i32_0 = arith.constant 0 : i32
    %c0_i32_1 = arith.constant 0 : i32
    %c0_i32_2 = arith.constant 0 : i32
    return %c0_i32, %c0_i32_0, %c0_i32_1 : i32, i32, i32
  }
  func.func @transform_1(%arg0: i32) -> (i32, i32, i32) {
    %c0_i32 = arith.constant 0 : i32
    %c0_i32_0 = arith.constant 0 : i32
    %c0_i32_1 = arith.constant 0 : i32
    %c0_i32_2 = arith.constant 0 : i32
    return %c0_i32, %c0_i32_0, %c0_i32_1 : i32, i32, i32
  }
  func.func @transform_2(%arg0: i32) -> (i32, i32, i32) {
    %c0_i32 = arith.constant 0 : i32
    %c0_i32_0 = arith.constant 0 : i32
    %c0_i32_1 = arith.constant 0 : i32
    %c0_i32_2 = arith.constant 0 : i32
    return %c0_i32, %c0_i32_0, %c0_i32_1 : i32, i32, i32
  }
  func.func @transform_3(%arg0: i32) -> (i32, i32, i32) {
    %c0_i32 = arith.constant 0 : i32
    %c0_i32_0 = arith.constant 0 : i32
    %c0_i32_1 = arith.constant 0 : i32
    %c0_i32_2 = arith.constant 0 : i32
    return %c0_i32, %c0_i32_0, %c0_i32_1 : i32, i32, i32
  }
  func.func @transform_4(%arg0: i32) -> (i32, i32) {
    %c0_i32 = arith.constant 0 : i32
    %c0_i32_0 = arith.constant 0 : i32
    %c0_i32_1 = arith.constant 0 : i32
    return %c0_i32, %c0_i32_0 : i32, i32
  }
  func.func @transform_5(%arg0: i32) -> (i32, i32) {
    %c0_i32 = arith.constant 0 : i32
    %c0_i32_0 = arith.constant 0 : i32
    %c0_i32_1 = arith.constant 0 : i32
    return %c0_i32, %c0_i32_0 : i32, i32
  }
  func.func @transform_6(%arg0: i32) -> (i32, i32) {
    %c0_i32 = arith.constant 0 : i32
    %c0_i32_0 = arith.constant 0 : i32
    %c0_i32_1 = arith.constant 0 : i32
    return %c0_i32, %c0_i32_0 : i32, i32
  }
}

</mosaic_0001>

<bundles_post_ra>
// kernel: bert_lr_last4layer_forward.50
= control target key start
LH: loop header
LB: loop body
LE: loop exit
PB: predicated region body
PF: predicated region fallthrough
CT: control target
= control target key end

     0   :  { %vm22_vm0 = vcmask 261120   ;;  %v50_v17 = vlaneseq  ;;  %vm70_vm1 = vcmask 257024   ;;  %s128_s0 = inlined_call_operand.vmem [shape: bf16[16,32], index: 0, kind: input, shape index: {}]   ;;  %s129_s1 = inlined_call_operand.vmem [shape: bf16[1,32], index: 1, kind: input, shape index: {}]   ;;  %s130_s2 = inlined_call_operand.vmem [shape: bf16[1,32], index: 2, kind: input, shape index: {}]   ;;  %s131_s3 = inlined_call_operand.vmem [shape: bf16[16,32], index: 3, kind: output, shape index: {}]  }
   0x1   :  { %v82_v0 = vld [vmem:[%s128_s0] sm:$0xff]  }
   0x2   :  { %v83_v1 = vunpack.c.l.bf16 %v82_v0  ;;  %v84_v2 = vunpack.c.h.bf16 %v82_v0  ;;  %v51_v21 = vshrl.u32 %v50_v17, 7  ;;  %v18_v22 = vld [vmem:[%s129_s1] sm:$0x1] }
   0x3   :  { %v20_v24 = vld [vmem:[%s130_s2] sm:$0x1]  ;;  %v19_v25 = vunpack.c.l.bf16 %v18_v22 }
   0x4   :  { %v23_v3 = vsel %vm22_vm0, %v83_v1, 0.0  ;;  %v26_v4 = vsel %vm22_vm0, %v84_v2, 0.0  ;;  %v52_v26 = vsub.s32 0, %v51_v21  ;;  %v21_v27 = vunpack.c.l.bf16 %v20_v24 }
   0x5   :  { %24 = vadd.xlane.f32.xlu0 %v23_v3 }
   0x6   :  { %v53_v28 = vrot.slane %v19_v25, %v52_v26  ;;  %v59_v30 = vrot.slane %v21_v27, %v52_v26 }
   0x9   :  { %27 = vadd.xlane.f32.xlu0 %v26_v4 }
  0x92   :  { %v25_v5 = vpop.xlane.xlu0 %24 }
  0x93   :  { %v30_v6 = vmul.f32 0.03125, %v25_v5 }
  0x95   :  { %v32_v7 = vsub.f32 %v83_v1, %v30_v6 }
  0x96   :  { %v28_v8 = vpop.xlane.xlu0 %27 }
  0x97   :  { %v31_v9 = vmul.f32 0.03125, %v28_v8  ;;  %v34_v10 = vmul.f32 %v32_v7, %v32_v7 }
  0x99   :  { %v33_v11 = vsub.f32 %v84_v2, %v31_v9  ;;  %v36_v12 = vsel %vm22_vm0, %v34_v10, 0.0 }
  0x9a   :  { %37 = vadd.xlane.f32.xlu1 %v36_v12 }
  0x9b   :  { %v35_v13 = vmul.f32 %v33_v11, %v33_v11 }
  0x9d   :  { %v39_v14 = vsel %vm22_vm0, %v35_v13, 0.0 }
  0x9e   :  { %40 = vadd.xlane.f32.xlu1 %v39_v14 }
 0x127   :  { %v38_v15 = vpop.xlane.xlu1 %37 }
 0x128   :  { %v42_v16 = vmul.f32 0.03125, %v38_v15 }
 0x12a   :  { %v44_v18 = vadd.f32 1e-12, %v42_v16 }
 0x12b   :  { %v41_v19 = vpop.xlane.xlu1 %40 }
 0x12c   :  { %85 = vrsqrt.f32 %v44_v18  ;;  %v43_v20 = vmul.f32 0.03125, %v41_v19 }
 0x12e   :  { %v45_v23 = vadd.f32 1e-12, %v43_v20 }
 0x130   :  { %87 = vrsqrt.f32 %v45_v23 }
 0x136   :  { %v86_v29 = vpop.eup %85 }
 0x137   :  { %v48_v31 = vmul.f32 %v86_v29, %v32_v7 }
 0x139   :  { %v54_v32 = vmul.f32 %v53_v28, %v48_v31 }
 0x13a   :  { %v88_v33 = vpop.eup %87 }
 0x13b   :  { %v60_v34 = vadd.f32 %v59_v30, %v54_v32  ;;  %v49_v35 = vmul.f32 %v88_v33, %v33_v11 }
 0x13d   :  { %v79_v36 = vpack.c.bf16 %v60_v34, %v60_v34  ;;  %v55_v37 = vmul.f32 %v53_v28, %v49_v35 }
 0x13f   :  { %71 = vst.msk [vmem:[%s131_s3] sm:$0xf] %vm70_vm1, %v79_v36  ;;  %v61_v38 = vadd.f32 %v59_v30, %v55_v37 }
 0x141   :  { %v80_v39 = vpack.c.bf16 %v61_v38, %v61_v38 }
 0x143   :  { %72 = vst.msk [vmem:[%s131_s3 + $0x4] sm:$0xf] %vm70_vm1, %v80_v39 }

// kernel: bert_lr_last4layer_forward.51
= control target key start
LH: loop header
LB: loop body
LE: loop exit
PB: predicated region body
PF: predicated region fallthrough
CT: control target
= control target key end

     0   :  { %v337_v0 = vmov 0.0   ;;  %vm338_vm0 = vmmov 0   ;;  %vm59_vm1 = vcmask 261120   ;;  %v38_v8 = vlaneseq  ;;  %s446_s1 = inlined_call_operand.vmem [shape: bf16[32,32], index: 1, kind: input, shape index: {}]   ;;  %s447_s2 = inlined_call_operand.vmem [shape: bf16[32,32], index: 2, kind: input, shape index: {}]   ;;  %s448_s0 = inlined_call_operand.vmem [shape: bf16[16,32], index: 0, kind: input, shape index: {}]   ;;  %s449_s3 = inlined_call_operand.vmem [shape: bf16[32,32], index: 3, kind: input, shape index: {}]   ;;  %s450_s4 = inlined_call_operand.vmem [shape: bf16[1,32], index: 4, kind: input, shape index: {}]   ;;  %s451_s5 = inlined_call_operand.vmem [shape: bf16[1,32], index: 5, kind: input, shape index: {}]   ;;  %s452_s6 = inlined_call_operand.vmem [shape: bf16[1,32], index: 6, kind: input, shape index: {}]   ;;  %s453_s7 = inlined_call_operand.vmem [shape: bf16[16,32], index: 7, kind: output, shape index: {0}]   ;;  %s454_s8 = inlined_call_operand.vmem [shape: bf16[16,32], index: 8, kind: output, shape index: {1}]   ;;  %s455_s9 = inlined_call_operand.vmem [shape: bf16[16,32], index: 9, kind: output, shape index: {2}]  }
   0x1   :  { %304 = vmatprep.subr.bf16.mxu0 %v337_v0  ;;  %v330_v1 = vld [vmem:[%s446_s1] sm:$0xff]   ;;  %312 = vmatprep.subr.bf16.mxu1 %v337_v0  ;;  %v331_v2 = vld [vmem:[%s446_s1 + $0x8] sm:$0xff]   ;;  %vm112_vm2 = vcmask 257024  }
   0x2   :  { %308 = vmatprep.mubr.msk.bf16.mxu0 %vm338_vm0, %v337_v0  ;;  %316 = vmatprep.mubr.msk.bf16.mxu1 %vm338_vm0, %v337_v0  ;;  %v332_v3 = vld [vmem:[%s447_s2] sm:$0xff]   ;;  %v335_v5 = vld [vmem:[%s447_s2 + $0x8] sm:$0xff]   ;;  %v39_v9 = vshrl.u32 %v38_v8, 7 }
   0x3   :  { %305 = vmatpush3.bf16.msra.mxu0 %v330_v1  ;;  %313 = vmatpush3.bf16.msra.mxu1 %v332_v3  ;;  %v333_v4 = vld [vmem:[%s448_s0] sm:$0xff]   ;;  %v336_v7 = vld [vmem:[%s449_s3 + $0x8] sm:$0xff]  }
   0x4   :  { %306 = vmatprep.subr.bf16.mxu0 %v337_v0  ;;  %314 = vmatprep.subr.bf16.mxu1 %v337_v0  ;;  %v334_v6 = vld [vmem:[%s449_s3] sm:$0xff]   ;;  %v40_v13 = vsub.s32 0, %v39_v9 }
   0x5   :  { %v36_v10 = vld [vmem:[%s450_s4] sm:$0x1] }
   0x6   :  { %v119_v11 = vld [vmem:[%s451_s5] sm:$0x1]  ;;  %v37_v12 = vunpack.c.l.bf16 %v36_v10 }
   0x7   :  { %307 = vmatpush3.bf16.msra.mxu0 %v331_v2  ;;  %315 = vmatpush3.bf16.msra.mxu1 %v335_v5  ;;  %v120_v14 = vunpack.c.l.bf16 %v119_v11  ;;  %v192_v16 = vld [vmem:[%s452_s6] sm:$0x1] }
   0x8   :  { %320 = vmatprep.subr.bf16.mxu0 %v337_v0  ;;  %v41_v15 = vrot.slane %v37_v12, %v40_v13  ;;  %v193_v21 = vunpack.c.l.bf16 %v192_v16 }
   0x9   :  { %v124_v17 = vrot.slane %v120_v14, %v40_v13 }
   0xa   :  { %309 = vmatmul.mubr.msk.bf16.vlgmr.msra.gmra.mrb[0].mxu0 %vm59_vm1, %v333_v4  ;;  %317 = vmatmul.mubr.msk.bf16.vlgmr.msra.gmra.mrb[0].mxu1 %vm59_vm1, %v333_v4  ;;  %v197_v33 = vrot.slane %v193_v21, %v40_v13 }
   0xb   :  { %321 = vmatpush3.bf16.msra.mxu0 %v334_v6  ;;  %324 = vmatprep.mubr.msk.bf16.mxu0 %vm338_vm0, %v337_v0 }
   0xc   :  { %322 = vmatprep.subr.bf16.mxu0 %v337_v0 }
   0xf   :  { %323 = vmatpush3.bf16.msra.mxu0 %v336_v7 }
  0x12   :  { %325 = vmatmul.mubr.msk.bf16.vlgmr.msra.gmra.mrb[4].mxu0 %vm59_vm1, %v333_v4 }
  0xdd   :  { %v97_v18 = vpop.f32.mrb[0].mxu0  ;;  %v171_v23 = vpop.f32.mrb[0].mxu1 }
  0xde   :  { %v98_v19 = vadd.f32 %v97_v18, %v41_v15  ;;  %v310_v20 = vpop.f32.mrb[1].mxu0  ;;  %v172_v27 = vadd.f32 %v171_v23, %v124_v17  ;;  %v318_v28 = vpop.f32.mrb[1].mxu1 }
  0xdf   :  { %v100_v22 = vpop.f32.mrb[2].mxu0  ;;  %v174_v29 = vpop.f32.mrb[2].mxu1 }
  0xe0   :  { %v289_v24 = vpack.c.bf16 %v98_v19, %v98_v19  ;;  %v101_v25 = vadd.f32 %v100_v22, %v41_v15  ;;  %v311_v26 = vpop.f32.mrb[3].mxu0  ;;  %v291_v31 = vpack.c.bf16 %v172_v27, %v172_v27  ;;  %v175_v32 = vadd.f32 %v174_v29, %v124_v17  ;;  %v319_v34 = vpop.f32.mrb[3].mxu1 }
  0xe2   :  { %113 = vst.msk [vmem:[%s453_s7] sm:$0xf] %vm112_vm2, %v289_v24  ;;  %v290_v30 = vpack.c.bf16 %v101_v25, %v101_v25  ;;  %186 = vst.msk [vmem:[%s454_s8] sm:$0xf] %vm112_vm2, %v291_v31  ;;  %v292_v35 = vpack.c.bf16 %v175_v32, %v175_v32 }
  0xe4   :  { %114 = vst.msk [vmem:[%s453_s7 + $0x4] sm:$0xf] %vm112_vm2, %v290_v30  ;;  %187 = vst.msk [vmem:[%s454_s8 + $0x4] sm:$0xf] %vm112_vm2, %v292_v35 }
  0xe5   :  { %v244_v36 = vpop.f32.mrb[4].mxu0 }
  0xe6   :  { %v245_v37 = vadd.f32 %v244_v36, %v197_v33  ;;  %v326_v38 = vpop.f32.mrb[5].mxu0 }
  0xe7   :  { %v247_v39 = vpop.f32.mrb[6].mxu0 }
  0xe8   :  { %v293_v40 = vpack.c.bf16 %v245_v37, %v245_v37  ;;  %v248_v41 = vadd.f32 %v247_v39, %v197_v33  ;;  %v327_v42 = vpop.f32.mrb[7].mxu0 }
  0xea   :  { %259 = vst.msk [vmem:[%s455_s9] sm:$0xf] %vm112_vm2, %v293_v40  ;;  %v294_v43 = vpack.c.bf16 %v248_v41, %v248_v41 }
  0xec   :  { %260 = vst.msk [vmem:[%s455_s9 + $0x4] sm:$0xf] %vm112_vm2, %v294_v43 }

// kernel: bert_lr_last4layer_forward.52
= control target key start
LH: loop header
LB: loop body
LE: loop exit
PB: predicated region body
PF: predicated region fallthrough
CT: control target
= control target key end

     0   :  { %s1045_s12 = smov 0   ;;  %s1047_s13 = smov 0   ;;  %s1156_s0 = inlined_call_operand.vmem [shape: bf16[16,32], index: 0, kind: input, shape index: {}]   ;;  %s1157_s1 = inlined_call_operand.vmem [shape: bf16[16,32], index: 1, kind: input, shape index: {}]   ;;  %s1158_s2 = inlined_call_operand.vmem [shape: bf16[16,32], index: 2, kind: input, shape index: {}]   ;;  %s1159_s3 = inlined_call_operand.vmem [shape: bf16[16,32], index: 3, kind: output, shape index: {}]  }
   0x1   :  { %s1049_s14 = smov 0  }
   0x2 LB: > { %s32_s15 = sadd.s32 1, %s1011_s13  ;;  %p860_p0 = scmp.ge.s32.totalorder %s1015_s14, 1  ;;  %s1015_s14 = sphi %s1049_s14, %s13_s14   ;;  %s1011_s13 = sphi %s1047_s13, %s1161_s13   ;;  %s1007_s12 = sphi %s1045_s12, %s1160_s12  }
   0x3   : > { %p34_p1 = scmp.ge.s32.totalorder %s32_s15, 2  ;;  %p196_p2 = scmp.lt.s32.totalorder %s1015_s14, 3 }
   0x5   : > { %s1163_s15 = smov (%p34_p1, %s32_s15), 0  ;;  %p197_p3 = pnand %p860_p0, %p196_p2 }
   0x6   : > { %p241_p4 = scmp.lt.s32.totalorder (!%p197_p3), %s1007_s12, 1  ;;  %v1017_v0 = vmov (!%p197_p3), 0.0   ;;  %vm1018_vm0 = vmmov (!%p197_p3), 0   ;;  %vm276_vm1 = vcmask (!%p197_p3), 64512   ;;  %s1019_s23 = smov (!%p197_p3), 120   ;;  %vm337_vm2 = vcmask (!%p197_p3), 1043456  }
   0x7   : > { %200 = sbr.rel (%p197_p3) target bundleno = 1168 (0x490), region = 32  ;;  %894 = vmatprep.subr.bf16.mxu0 (!%p197_p3), %v1017_v0  ;;  %896 = vmatprep.mubr.msk.bf16.mxu0 (!%p197_p3), %vm1018_vm0, %v1017_v0  ;;  %s1020_s24 = smov (!%p197_p3), 112   ;;  %vm738_vm3 = vcmask (!%p197_p3), 130048   ;;  %vm740_vm4 = vcmask (!%p197_p3), 195584   ;;  %vm743_vm5 = vcmask (!%p197_p3), 257024  }
   0x8   : > { %900 = vmatprep.subr.bf16.mxu1 (!%p197_p3), %v1017_v0  ;;  %902 = vmatprep.mubr.msk.bf16.mxu1 (!%p197_p3), %vm1018_vm0, %v1017_v0  ;;  %s1021_s25 = smov (!%p197_p3), 104   ;;  %s1022_s29 = smov (!%p197_p3), 8  }
   0x9   : > { %s1023_s30 = smov (!%p197_p3), 16   ;;  %s1024_s4 = smov (!%p197_p3), 24  }
   0xe   : > { %s1165_s12 = smov (!%p241_p4, %s1007_s12), 1 }
   0xf   : > { %s1069_s16 = sshll.u32 %s1165_s12, 2 }
  0x10   : > { %s255_s19 = scalar_lea.vmem %s1157_s1, %s1069_s16  ;;  %s247_s22 = scalar_lea.vmem %s1156_s0, %s1069_s16 }
  0x11   : > { %v274_v1 = vld [vmem:[%s255_s19] sm:$0xf]  ;;  %s262_s28 = scalar_lea.vmem %s1158_s2, %s1069_s16  ;;  %s270_s7 = scalar_lea.vmem %s1159_s3, %s1069_s16 }
  0x12   : > { %v281_v2 = vsel %vm276_vm1, %v274_v1, 0  ;;  %v273_v3 = vld [vmem:[%s247_s22] sm:$0xf]  ;;  %v868_v5 = vcombine.low %v274_v1, %v274_v1 }
  0x13   : > { %895 = vmatpush3.bf16.xpose.msra.mxu0 %v281_v2  ;;  %v867_v4 = vcombine.low %v273_v3, %v273_v3  ;;  %v275_v12 = vld [vmem:[%s262_s28] sm:$0xf] }
  0x14   : > { %912 = vmatprep.subr.bf16.mxu0 %v1017_v0  ;;  %v339_v13 = vsel %vm337_vm2, %v275_v12, 0  ;;  %v870_v45 = vcombine.low %v275_v12, %v275_v12 }
  0x15   : > { %386 = vrot.lane.b32.xlu1 %v867_v4, %s1019_s23  ;;  %901 = vmatpush3.bf16.msra.mxu1 %v339_v13 }
  0x16   : > { %906 = vmatprep.subr.bf16.mxu1 %v1017_v0 }
  0x19   : > { %505 = vrot.lane.b32.xlu1 %v868_v5, %s1020_s24 }
  0x1a   : > { %897 = vmatmul.mubr.msk.bf16.vlgmr.msra.gmra.mrb[0].mxu0 %vm276_vm1, %v273_v3 }
  0x1b   : > { %914 = vmatprep.mubr.msk.bf16.mxu0 %vm1018_vm0, %v1017_v0 }
  0x1d   : > { %503 = vrot.lane.b32.xlu1 %v867_v4, %s1020_s24 }
  0x21   : > { %616 = vrot.lane.b32.xlu1 %v868_v5, %s1021_s25 }
  0x25   : > { %614 = vrot.lane.b32.xlu1 %v867_v4, %s1021_s25 }
  0x87   : > { %v387_v19 = vpop.permute.xlu1 %386 }
  0x8b   : > { %v506_v22 = vpop.permute.xlu1 %505 }
  0x8c   : > { %v511_v23 = vsel %vm276_vm1, %v506_v22, 0 }
  0x8f   : > { %v504_v24 = vpop.permute.xlu1 %503 }
  0x93   : > { %v617_v25 = vpop.permute.xlu1 %616 }
  0x94   : > { %v622_v26 = vsel %vm276_vm1, %v617_v25, 0 }
  0x97   : > { %v615_v27 = vpop.permute.xlu1 %614 }
  0xed   : > { %v317_v6 = vpop.f32.mrb[0].mxu0 }
  0xee   : > { %v323_v7 = vmul.f32 0.35355338, %v317_v6  ;;  %v898_v8 = vpop.f32.mrb[1].mxu0 }
  0xef   : > { %v320_v9 = vpop.f32.mrb[2].mxu0 }
  0xf0   : > { %v899_v10 = vpop.f32.mrb[3].mxu0  ;;  %v324_v11 = vsel %vm276_vm1, %v323_v7, -inf }
  0xf1   : > { %325 = vmax.xlane.f32.xlu0 %v324_v11 }
 0x107   : > { %391 = vrot.lane.b32.xlu0 %v868_v5, %s1019_s23 }
 0x17e   : > { %v326_v14 = vpop.xlane.xlu0 %325 }
 0x17f   : > { %v327_v15 = vsub.f32 %v323_v7, %v326_v14 }
 0x181   : > { %v328_v16 = vmul.f32 1.442695, %v327_v15 }
 0x182   : > { %v392_v17 = vpop.permute.xlu0 %391 }
 0x183   : > { %977 = vpow2.f32 %v328_v16  ;;  %v397_v20 = vsel %vm276_vm1, %v392_v17, 0 }
 0x18d   : > { %v1097_v18 = vpop.eup %977 }
 0x18e   : > { %v333_v21 = vpack.c.bf16 %v1097_v18, %v1097_v18  ;;  %v330_v12 = vsel %vm276_vm1, %v1097_v18, 0.0 }
 0x190   : > { %903 = vmatmul.mubr.msk.bf16.vlgmr.msra.gmra.mrb[0].mxu1 %vm276_vm1, %v333_v21 }
 0x191   : > { %907 = vmatpush3.bf16.xpose.msra.mxu1 %v397_v20  ;;  %908 = vmatprep.mubr.msk.bf16.mxu1 %vm1018_vm0, %v1017_v0 }
 0x192   : > { %918 = vmatprep.subr.bf16.mxu1 %v1017_v0 }
 0x198   : > { %909 = vmatmul.mubr.msk.bf16.vlgmr.msra.gmra.mrb[4].mxu1 %vm276_vm1, %v387_v19 }
 0x199   : > { %919 = vmatpush3.bf16.xpose.msra.mxu1 %v511_v23  ;;  %920 = vmatprep.mubr.msk.bf16.mxu1 %vm1018_vm0, %v1017_v0 }
 0x19a   : > { %930 = vmatprep.subr.bf16.mxu1 %v1017_v0 }
 0x1a0   : > { %921 = vmatmul.mubr.msk.bf16.vlgmr.msra.gmra.mrb[8].mxu1 %vm276_vm1, %v504_v24 }
 0x1a1   : > { %931 = vmatpush3.bf16.xpose.msra.mxu1 %v622_v26  ;;  %932 = vmatprep.mubr.msk.bf16.mxu1 %vm1018_vm0, %v1017_v0 }
 0x1a8   : > { %933 = vmatmul.mubr.msk.bf16.vlgmr.msra.gmra.mrb[12].mxu1 %vm276_vm1, %v615_v27 }
 0x263   : > { %v1116_v28 = vpop.f32.mrb[0].mxu1 }
 0x264   : > { %v904_v29 = vpop.f32.mrb[1].mxu1 }
 0x265   : > { %v378_v30 = vpop.f32.mrb[2].mxu1 }
 0x266   : > { %v905_v31 = vpop.f32.mrb[3].mxu1 }
 0x26b   : > { %v433_v32 = vpop.f32.mrb[4].mxu1 }
 0x26c   : > { %v439_v33 = vmul.f32 0.35355338, %v433_v32  ;;  %v910_v34 = vpop.f32.mrb[5].mxu1 }
 0x26d   : > { %v436_v35 = vpop.f32.mrb[6].mxu1 }
 0x26e   : > { %v911_v36 = vpop.f32.mrb[7].mxu1  ;;  %v440_v37 = vsel %vm276_vm1, %v439_v33, -inf }
 0x26f   : > { %441 = vmax.xlane.f32.xlu1 %v440_v37 }
 0x273   : > { %v547_v38 = vpop.f32.mrb[8].mxu1 }
 0x274   : > { %v553_v39 = vmul.f32 0.35355338, %v547_v38  ;;  %v922_v40 = vpop.f32.mrb[9].mxu1 }
 0x275   : > { %v550_v41 = vpop.f32.mrb[10].mxu1 }
 0x276   : > { %v554_v42 = vsel %vm276_vm1, %v553_v39, -inf  ;;  %v923_v43 = vpop.f32.mrb[11].mxu1 }
 0x277   : > { %555 = vmax.xlane.f32.xlu0 %v554_v42 }
 0x27b   : > { %v658_v44 = vpop.f32.mrb[12].mxu1 }
 0x27c   : > { %v934_v46 = vpop.f32.mrb[13].mxu1  ;;  %v664_v49 = vmul.f32 0.35355338, %v658_v44 }
 0x27d   : > { %v661_v47 = vpop.f32.mrb[14].mxu1 }
 0x27e   : > { %v935_v48 = vpop.f32.mrb[15].mxu1  ;;  %v665_v50 = vsel %vm276_vm1, %v664_v49, -inf }
 0x280   : > { %564 = vrot.lane.b32.xlu1 %v870_v45, %s1020_s24 }
 0x28d   : > { %453 = vrot.lane.b32.xlu0 %v870_v45, %s1019_s23 }
 0x2a4   : > { %666 = vmax.xlane.f32.xlu1 %v665_v50 }
 0x2b5   : > { %675 = vrot.lane.b32.xlu1 %v870_v45, %s1021_s25 }
 0x2fc   : > { %v442_v51 = vpop.xlane.xlu1 %441 }
 0x2fd   : > { %v443_v52 = vsub.f32 %v439_v33, %v442_v51 }
 0x2ff   : > { %v444_v53 = vmul.f32 1.442695, %v443_v52 }
 0x300   : > { %v565_v60 = vpop.permute.xlu1 %564 }
 0x301   : > { %979 = vpow2.f32 %v444_v53  ;;  %v570_v63 = vsel %vm337_vm2, %v565_v60, 0 }
 0x304   : > { %v556_v54 = vpop.xlane.xlu0 %555 }
 0x305   : > { %v557_v55 = vsub.f32 %v553_v39, %v556_v54 }
 0x307   : > { %v558_v56 = vmul.f32 1.442695, %v557_v55 }
 0x308   : > { %v454_v57 = vpop.permute.xlu0 %453 }
 0x309   : > { %981 = vpow2.f32 %v558_v56  ;;  %v459_v58 = vsel %vm337_vm2, %v454_v57, 0 }
 0x30a   : > { %913 = vmatpush3.bf16.msra.mxu0 %v459_v58 }
 0x30b   : > { %v980_v59 = vpop.eup %979  ;;  %924 = vmatprep.subr.bf16.mxu0 %v1017_v0 }
 0x30c   : > { %v446_v61 = vsel %vm276_vm1, %v980_v59, 0.0  ;;  %v449_v62 = vpack.c.bf16 %v980_v59, %v980_v59 }
 0x30d   : > { %447 = vadd.xlane.f32.xlu0 %v446_v61 }
 0x30e   : > { %915 = vmatmul.mubr.msk.bf16.vlgmr.msra.gmra.mrb[4].mxu0 %vm276_vm1, %v449_v62 }
 0x30f   : > { %925 = vmatpush3.bf16.msra.mxu0 %v570_v63  ;;  %926 = vmatprep.mubr.msk.bf16.mxu0 %vm1018_vm0, %v1017_v0 }
 0x310   : > { %936 = vmatprep.subr.bf16.mxu0 %v1017_v0 }
 0x313   : > { %v982_v1 = vpop.eup %981 }
 0x314   : > { %v560_v2 = vsel %vm276_vm1, %v982_v1, 0.0  ;;  %v563_v3 = vpack.c.bf16 %v982_v1, %v982_v1 }
 0x315   : > { %561 = vadd.xlane.f32.xlu1 %v560_v2 }
 0x316   : > { %927 = vmatmul.mubr.msk.bf16.vlgmr.msra.gmra.mrb[8].mxu0 %vm276_vm1, %v563_v3 }
 0x317   : > { %938 = vmatprep.mubr.msk.bf16.mxu0 %vm1018_vm0, %v1017_v0 }
 0x331   : > { %v667_v4 = vpop.xlane.xlu1 %666 }
 0x332   : > { %v668_v5 = vsub.f32 %v664_v49, %v667_v4 }
 0x334   : > { %v669_v6 = vmul.f32 1.442695, %v668_v5 }
 0x335   : > { %v676_v7 = vpop.permute.xlu1 %675 }
 0x336   : > { %983 = vpow2.f32 %v669_v6  ;;  %v681_v8 = vsel %vm337_vm2, %v676_v7, 0 }
 0x337   : > { %937 = vmatpush3.bf16.msra.mxu0 %v681_v8 }
 0x340   : > { %v984_v9 = vpop.eup %983 }
 0x341   : > { %v671_v10 = vsel %vm276_vm1, %v984_v9, 0.0  ;;  %v674_v11 = vpack.c.bf16 %v984_v9, %v984_v9 }
 0x342   : > { %672 = vadd.xlane.f32.xlu0 %v671_v10 }
 0x343   : > { %939 = vmatmul.mubr.msk.bf16.vlgmr.msra.gmra.mrb[12].mxu0 %vm276_vm1, %v674_v11 }
 0x346   : > { %331 = vadd.xlane.f32.xlu0 %v330_v12 }
 0x39a   : > { %v448_v0 = vpop.xlane.xlu0 %447 }
 0x39b   : > { %985 = vrcp.f32 %v448_v0 }
 0x3a2   : > { %v562_v13 = vpop.xlane.xlu1 %561 }
 0x3a3   : > { %987 = vrcp.f32 %v562_v13 }
 0x3a5   : > { %v986_v14 = vpop.eup %985 }
 0x3ad   : > { %v988_v21 = vpop.eup %987 }
 0x3cf   : > { %v673_v26 = vpop.xlane.xlu0 %672 }
 0x3d0   : > { %989 = vrcp.f32 %v673_v26 }
 0x3d3   : > { %v332_v34 = vpop.xlane.xlu0 %331 }
 0x3d4   : > { %991 = vrcp.f32 %v332_v34 }
 0x3da   : > { %v990_v27 = vpop.eup %989 }
 0x3de   : > { %v992_v35 = vpop.eup %991 }
 0x3df   : > { %v382_v37 = vmul.f32 %v992_v35, %v1116_v28 }
 0x3e1   : > { %v495_v15 = vpop.f32.mrb[4].mxu0 }
 0x3e2   : > { %v502_v16 = vmul.f32 %v986_v14, %v495_v15  ;;  %v916_v17 = vpop.f32.mrb[5].mxu0 }
 0x3e3   : > { %v498_v19 = vpop.f32.mrb[6].mxu0 }
 0x3e4   : > { %726 = vrot.lane.b32.xlu1 %v502_v16, %s1022_s29  ;;  %v917_v20 = vpop.f32.mrb[7].mxu0 }
 0x3e9   : > { %v606_v22 = vpop.f32.mrb[8].mxu0 }
 0x3ea   : > { %v613_v23 = vmul.f32 %v988_v21, %v606_v22  ;;  %v928_v24 = vpop.f32.mrb[9].mxu0 }
 0x3eb   : > { %v609_v25 = vpop.f32.mrb[10].mxu0 }
 0x3ec   : > { %730 = vrot.lane.b32.xlu0 %v613_v23, %s1023_s30  ;;  %v929_v18 = vpop.f32.mrb[11].mxu0 }
 0x416   : > { %v717_v29 = vpop.f32.mrb[12].mxu0 }
 0x417   : > { %v724_v30 = vmul.f32 %v990_v27, %v717_v29  ;;  %v940_v31 = vpop.f32.mrb[13].mxu0 }
 0x418   : > { %v720_v32 = vpop.f32.mrb[14].mxu0 }
 0x419   : > { %734 = vrot.lane.b32.xlu1 %v724_v30, %s1024_s4  ;;  %v941_v33 = vpop.f32.mrb[15].mxu0 }
 0x456   : > { %v727_v36 = vpop.permute.xlu1 %726 }
 0x457   : > { %v737_v39 = vsel %vm276_vm1, %v382_v37, %v727_v36 }
 0x45e   : > { %v731_v38 = vpop.permute.xlu0 %730 }
 0x45f   : > { %v739_v40 = vsel %vm738_vm3, %v737_v39, %v731_v38 }
 0x48b   : > { %v735_v41 = vpop.permute.xlu1 %734 }
 0x48c   : > { %v741_v42 = vsel %vm740_vm4, %v739_v40, %v735_v41 }
 0x48d   : > { %v742_v43 = vpack.c.bf16 %v741_v42, %v741_v42 }
 0x48f   : > { %744 = vst.msk [vmem:[%s270_s7] sm:$0xf] %vm743_vm5, %v742_v43 }
 0x490 PF: > { %s13_s14 = sadd.s32 1, %s1015_s14   ;;  %s1160_s12 = smov %s1011_s13 }
 0x491   : > { %p10_p5 = scmp.ge.s32.totalorder %s13_s14, 4   ;;  %s1161_s13 = smov %s1163_s15 }
 0x493   :  { %12 = sbr.rel (!%p10_p5) target bundleno = 2 (0x2), region = 68 }

// kernel: bert_lr_last4layer_forward.53
= control target key start
LH: loop header
LB: loop body
LE: loop exit
PB: predicated region body
PF: predicated region fallthrough
CT: control target
= control target key end

     0   :  { %v194_v0 = vmov 0.0   ;;  %vm195_vm0 = vmmov 0   ;;  %vm53_vm1 = vcmask 261120   ;;  %v32_v4 = vlaneseq  ;;  %s263_s1 = inlined_call_operand.vmem [shape: bf16[32,32], index: 1, kind: input, shape index: {}]   ;;  %s264_s0 = inlined_call_operand.vmem [shape: bf16[16,32], index: 0, kind: input, shape index: {}]   ;;  %s265_s2 = inlined_call_operand.vmem [shape: bf16[1,32], index: 2, kind: input, shape index: {}]   ;;  %s266_s3 = inlined_call_operand.vmem [shape: bf16[16,32], index: 3, kind: input, shape index: {}]   ;;  %s267_s4 = inlined_call_operand.vmem [shape: bf16[1,32], index: 4, kind: input, shape index: {}]   ;;  %s268_s5 = inlined_call_operand.vmem [shape: bf16[1,32], index: 5, kind: input, shape index: {}]   ;;  %s269_s6 = inlined_call_operand.vmem [shape: bf16[16,32], index: 6, kind: output, shape index: {}]  }
   0x1   :  { %177 = vmatprep.subr.bf16.mxu0 %v194_v0  ;;  %v187_v1 = vld [vmem:[%s263_s1] sm:$0xff]   ;;  %181 = vmatprep.mubr.msk.bf16.mxu0 %vm195_vm0, %v194_v0  ;;  %v188_v2 = vld [vmem:[%s263_s1 + $0x8] sm:$0xff]   ;;  %vm155_vm2 = vcmask 257024  }
   0x2   :  { %178 = vmatpush3.bf16.msra.mxu0 %v187_v1  ;;  %v189_v3 = vld [vmem:[%s264_s0] sm:$0xff]   ;;  %v33_v5 = vshrl.u32 %v32_v4, 7 }
   0x3   :  { %179 = vmatprep.subr.bf16.mxu0 %v194_v0  ;;  %v30_v6 = vld [vmem:[%s265_s2] sm:$0x1] }
   0x4   :  { %v31_v7 = vunpack.c.l.bf16 %v30_v6  ;;  %v34_v8 = vsub.s32 0, %v33_v5  ;;  %v171_v9 = vld [vmem:[%s266_s3] sm:$0xff]  }
   0x5   :  { %v172_v11 = vunpack.c.l.bf16 %v171_v9  ;;  %v173_v15 = vunpack.c.h.bf16 %v171_v9  ;;  %v104_v38 = vld [vmem:[%s267_s4] sm:$0x1] }
   0x6   :  { %180 = vmatpush3.bf16.msra.mxu0 %v188_v2  ;;  %v35_v10 = vrot.slane %v31_v7, %v34_v8  ;;  %v106_v40 = vld [vmem:[%s268_s5] sm:$0x1]  ;;  %v105_v41 = vunpack.c.l.bf16 %v104_v38 }
   0x7   :  { %v107_v42 = vunpack.c.l.bf16 %v106_v40 }
   0x8   :  { %v138_v43 = vrot.slane %v105_v41, %v34_v8 }
   0x9   :  { %182 = vmatmul.mubr.msk.bf16.vlgmr.msra.gmra.mrb[0].mxu0 %vm53_vm1, %v189_v3  ;;  %v144_v45 = vrot.slane %v107_v42, %v34_v8 }
  0xdc   :  { %v91_v12 = vpop.f32.mrb[0].mxu0 }
  0xdd   :  { %v92_v13 = vadd.f32 %v91_v12, %v35_v10  ;;  %v183_v14 = vpop.f32.mrb[1].mxu0 }
  0xde   :  { %v94_v16 = vpop.f32.mrb[2].mxu0 }
  0xdf   :  { %v95_v17 = vadd.f32 %v94_v16, %v35_v10  ;;  %v184_v18 = vpop.f32.mrb[3].mxu0  ;;  %v102_v19 = vadd.f32 %v172_v11, %v92_v13 }
  0xe1   :  { %v108_v20 = vsel %vm53_vm1, %v102_v19, 0.0  ;;  %v103_v21 = vadd.f32 %v173_v15, %v95_v17 }
  0xe2   :  { %109 = vadd.xlane.f32.xlu0 %v108_v20 }
  0xe3   :  { %v111_v22 = vsel %vm53_vm1, %v103_v21, 0.0 }
  0xe6   :  { %112 = vadd.xlane.f32.xlu0 %v111_v22 }
 0x16f   :  { %v110_v23 = vpop.xlane.xlu0 %109 }
 0x170   :  { %v115_v24 = vmul.f32 0.03125, %v110_v23 }
 0x172   :  { %v117_v25 = vsub.f32 %v102_v19, %v115_v24 }
 0x173   :  { %v113_v26 = vpop.xlane.xlu0 %112 }
 0x174   :  { %v116_v27 = vmul.f32 0.03125, %v113_v26  ;;  %v119_v28 = vmul.f32 %v117_v25, %v117_v25 }
 0x176   :  { %v118_v29 = vsub.f32 %v103_v21, %v116_v27  ;;  %v121_v30 = vsel %vm53_vm1, %v119_v28, 0.0 }
 0x177   :  { %122 = vadd.xlane.f32.xlu1 %v121_v30 }
 0x178   :  { %v120_v31 = vmul.f32 %v118_v29, %v118_v29 }
 0x17a   :  { %v124_v32 = vsel %vm53_vm1, %v120_v31, 0.0 }
 0x17b   :  { %125 = vadd.xlane.f32.xlu1 %v124_v32 }
 0x204   :  { %v123_v33 = vpop.xlane.xlu1 %122 }
 0x205   :  { %v127_v34 = vmul.f32 0.03125, %v123_v33 }
 0x207   :  { %v129_v35 = vadd.f32 1e-12, %v127_v34 }
 0x208   :  { %v126_v36 = vpop.xlane.xlu1 %125 }
 0x209   :  { %190 = vrsqrt.f32 %v129_v35  ;;  %v128_v37 = vmul.f32 0.03125, %v126_v36 }
 0x20b   :  { %v130_v39 = vadd.f32 1e-12, %v128_v37 }
 0x20d   :  { %192 = vrsqrt.f32 %v130_v39 }
 0x213   :  { %v191_v44 = vpop.eup %190 }
 0x214   :  { %v133_v46 = vmul.f32 %v191_v44, %v117_v25 }
 0x216   :  { %v139_v47 = vmul.f32 %v138_v43, %v133_v46 }
 0x217   :  { %v193_v48 = vpop.eup %192 }
 0x218   :  { %v145_v49 = vadd.f32 %v144_v45, %v139_v47  ;;  %v134_v50 = vmul.f32 %v193_v48, %v118_v29 }
 0x21a   :  { %v168_v51 = vpack.c.bf16 %v145_v49, %v145_v49  ;;  %v140_v52 = vmul.f32 %v138_v43, %v134_v50 }
 0x21c   :  { %156 = vst.msk [vmem:[%s269_s6] sm:$0xf] %vm155_vm2, %v168_v51  ;;  %v146_v53 = vadd.f32 %v144_v45, %v140_v52 }
 0x21e   :  { %v169_v54 = vpack.c.bf16 %v146_v53, %v146_v53 }
 0x220   :  { %157 = vst.msk [vmem:[%s269_s6 + $0x4] sm:$0xf] %vm155_vm2, %v169_v54 }

// kernel: bert_lr_last4layer_forward.54
= control target key start
LH: loop header
LB: loop body
LE: loop exit
PB: predicated region body
PF: predicated region fallthrough
CT: control target
= control target key end

     0   :  { %v324_v0 = vmov 0.0   ;;  %vm325_vm0 = vmmov 0   ;;  %vm56_vm1 = vcmask 261120   ;;  %v35_v8 = vlaneseq  ;;  %s421_s1 = inlined_call_operand.vmem [shape: bf16[32,64], index: 1, kind: input, shape index: {}]   ;;  %s422_s0 = inlined_call_operand.vmem [shape: bf16[16,32], index: 0, kind: input, shape index: {}]   ;;  %s423_s3 = inlined_call_operand.vmem [shape: bf16[64,32], index: 3, kind: input, shape index: {}]   ;;  %s424_s2 = inlined_call_operand.vmem [shape: bf16[1,64], index: 2, kind: input, shape index: {}]   ;;  %s425_s4 = inlined_call_operand.vmem [shape: bf16[1,32], index: 4, kind: input, shape index: {}]   ;;  %s426_s5 = inlined_call_operand.vmem [shape: bf16[1,32], index: 5, kind: input, shape index: {}]   ;;  %s427_s6 = inlined_call_operand.vmem [shape: bf16[1,32], index: 6, kind: input, shape index: {}]   ;;  %s428_s7 = inlined_call_operand.vmem [shape: bf16[16,32], index: 7, kind: output, shape index: {}]  }
   0x1   :  { %286 = vmatprep.subr.bf16.mxu0 %v324_v0  ;;  %v308_v1 = vld [vmem:[%s421_s1] sm:$0xff]   ;;  %290 = vmatprep.mubr.msk.bf16.mxu0 %vm325_vm0, %v324_v0  ;;  %v309_v2 = vld [vmem:[%s421_s1 + $0x8] sm:$0xff]   ;;  %v313_v6 = vld [vmem:[%s423_s3 + $0x10] sm:$0xff]   ;;  %vm158_vm2 = vcmask 523264   ;;  %vm258_vm3 = vcmask 257024  }
   0x2   :  { %294 = vmatprep.subr.bf16.mxu1 %v324_v0  ;;  %302 = vmatprep.mubr.msk.bf16.mxu1 %vm325_vm0, %v324_v0  ;;  %v375_v3 = vld [vmem:[%s422_s0] sm:$0xff]   ;;  %v312_v5 = vld [vmem:[%s423_s3 + $0x8] sm:$0xff]   ;;  %v314_v7 = vld [vmem:[%s423_s3 + $0x18] sm:$0xff]   ;;  %v36_v9 = vshrl.u32 %v35_v8, 7 }
   0x3   :  { %287 = vmatpush3.bf16.msra.mxu0 %v308_v1  ;;  %v311_v4 = vld [vmem:[%s423_s3] sm:$0xff]   ;;  %v203_v42 = vunpack.c.l.bf16 %v375_v3  ;;  %v204_v46 = vunpack.c.h.bf16 %v375_v3 }
   0x4   :  { %288 = vmatprep.subr.bf16.mxu0 %v324_v0  ;;  %295 = vmatpush3.bf16.msra.mxu1 %v311_v4  ;;  %v33_v10 = vld [vmem:[%s424_s2] sm:$0x1]  ;;  %v394_v12 = vsub.s32 0, %v36_v9 }
   0x5   :  { %296 = vmatprep.subr.bf16.mxu1 %v324_v0  ;;  %v34_v11 = vunpack.c.l.bf16 %v33_v10  ;;  %v128_v39 = vld [vmem:[%s425_s4] sm:$0x1] }
   0x6   :  { %v129_v40 = vunpack.c.l.bf16 %v128_v39 }
   0x7   :  { %289 = vmatpush3.bf16.msra.mxu0 %v309_v2  ;;  %v38_v13 = vrot.slane %v34_v11, %v394_v12 }
   0x8   :  { %297 = vmatpush3.bf16.msra.mxu1 %v312_v5  ;;  %v133_v41 = vrot.slane %v129_v40, %v394_v12  ;;  %v207_v5 = vld [vmem:[%s426_s5] sm:$0x1] }
   0x9   :  { %298 = vmatprep.subr.bf16.mxu1 %v324_v0  ;;  %v208_v8 = vunpack.c.l.bf16 %v207_v5 }
   0xa   :  { %291 = vmatmul.mubr.msk.bf16.vlgmr.msra.gmra.mrb[0].mxu0 %vm56_vm1, %v375_v3 }
   0xb   :  { %v241_v10 = vrot.slane %v208_v8, %v394_v12 }
   0xc   :  { %299 = vmatpush3.bf16.msra.mxu1 %v313_v6 }
   0xd   :  { %300 = vmatprep.subr.bf16.mxu1 %v324_v0 }
  0x10   :  { %301 = vmatpush3.bf16.msra.mxu1 %v314_v7  ;;  %v209_v7 = vld [vmem:[%s427_s6] sm:$0x1] }
  0x11   :  { %v210_v9 = vunpack.c.l.bf16 %v209_v7 }
  0xdd   :  { %v94_v14 = vpop.f32.mrb[0].mxu0 }
  0xde   :  { %v95_v15 = vadd.f32 %v94_v14, %v38_v13  ;;  %v292_v16 = vpop.f32.mrb[1].mxu0 }
  0xdf   :  { %v97_v17 = vpop.f32.mrb[2].mxu0 }
  0xe0   :  { %v101_v18 = vmul.f32 %v95_v15, %v95_v15  ;;  %v98_v19 = vadd.f32 %v97_v17, %v38_v13  ;;  %v293_v20 = vpop.f32.mrb[3].mxu0  ;;  %v247_v13 = vrot.slane %v210_v9, %v394_v12 }
  0xe2   :  { %v103_v21 = vmul.f32 %v101_v18, %v95_v15  ;;  %v102_v22 = vmul.f32 %v98_v19, %v98_v19 }
  0xe4   :  { %v105_v23 = vmul.f32 0.044715, %v103_v21  ;;  %v104_v24 = vmul.f32 %v102_v22, %v98_v19 }
  0xe6   :  { %v107_v25 = vadd.f32 %v105_v23, %v95_v15  ;;  %v106_v26 = vmul.f32 0.044715, %v104_v24 }
  0xe8   :  { %v109_v27 = vmul.f32 0.7978846, %v107_v25  ;;  %v108_v28 = vadd.f32 %v106_v26, %v98_v19 }
  0xea   :  { %316 = vtanh.f32 %v109_v27  ;;  %v110_v29 = vmul.f32 0.7978846, %v108_v28 }
  0xec   :  { %318 = vtanh.f32 %v110_v29 }
  0xf4   :  { %v317_v30 = vpop.eup %316 }
  0xf5   :  { %v113_v31 = vadd.f32 1.0, %v317_v30 }
  0xf6   :  { %v319_v32 = vpop.eup %318 }
  0xf7   :  { %v115_v33 = vmul.f32 0.5, %v113_v31  ;;  %v114_v34 = vadd.f32 1.0, %v319_v32 }
  0xf9   :  { %v116_v35 = vmul.f32 0.5, %v114_v34  ;;  %v117_v36 = vmul.f32 %v115_v33, %v95_v15 }
  0xfb   :  { %v118_v37 = vmul.f32 %v116_v35, %v98_v19 }
  0xfd   :  { %v119_v38 = vpack.c.bf16 %v118_v37, %v117_v36 }
  0xff   :  { %303 = vmatmul.mubr.msk.bf16.vlgmr.msra.gmra.mrb[0].mxu1 %vm158_vm2, %v119_v38 }
 0x1d2   :  { %v196_v43 = vpop.f32.mrb[0].mxu1 }
 0x1d3   :  { %v197_v44 = vadd.f32 %v196_v43, %v133_v41  ;;  %v304_v45 = vpop.f32.mrb[1].mxu1 }
 0x1d4   :  { %v199_v47 = vpop.f32.mrb[2].mxu1 }
 0x1d5   :  { %v200_v48 = vadd.f32 %v199_v47, %v133_v41  ;;  %v305_v49 = vpop.f32.mrb[3].mxu1  ;;  %v205_v50 = vadd.f32 %v203_v42, %v197_v44 }
 0x1d7   :  { %v211_v51 = vsel %vm56_vm1, %v205_v50, 0.0  ;;  %v206_v52 = vadd.f32 %v204_v46, %v200_v48 }
 0x1d8   :  { %212 = vadd.xlane.f32.xlu0 %v211_v51 }
 0x1d9   :  { %v214_v53 = vsel %vm56_vm1, %v206_v52, 0.0 }
 0x1dc   :  { %215 = vadd.xlane.f32.xlu0 %v214_v53 }
 0x265   :  { %v213_v54 = vpop.xlane.xlu0 %212 }
 0x266   :  { %v218_v55 = vmul.f32 0.03125, %v213_v54 }
 0x268   :  { %v220_v56 = vsub.f32 %v205_v50, %v218_v55 }
 0x269   :  { %v216_v57 = vpop.xlane.xlu0 %215 }
 0x26a   :  { %v219_v58 = vmul.f32 0.03125, %v216_v57  ;;  %v222_v59 = vmul.f32 %v220_v56, %v220_v56 }
 0x26c   :  { %v221_v60 = vsub.f32 %v206_v52, %v219_v58  ;;  %v224_v61 = vsel %vm56_vm1, %v222_v59, 0.0 }
 0x26d   :  { %225 = vadd.xlane.f32.xlu1 %v224_v61 }
 0x26e   :  { %v223_v62 = vmul.f32 %v221_v60, %v221_v60 }
 0x270   :  { %v227_v63 = vsel %vm56_vm1, %v223_v62, 0.0 }
 0x271   :  { %228 = vadd.xlane.f32.xlu1 %v227_v63 }
 0x2fa   :  { %v226_v0 = vpop.xlane.xlu1 %225 }
 0x2fb   :  { %v230_v1 = vmul.f32 0.03125, %v226_v0 }
 0x2fd   :  { %v232_v2 = vadd.f32 1e-12, %v230_v1 }
 0x2fe   :  { %v229_v3 = vpop.xlane.xlu1 %228 }
 0x2ff   :  { %320 = vrsqrt.f32 %v232_v2  ;;  %v231_v4 = vmul.f32 0.03125, %v229_v3 }
 0x301   :  { %v233_v6 = vadd.f32 1e-12, %v231_v4 }
 0x303   :  { %322 = vrsqrt.f32 %v233_v6 }
 0x309   :  { %v321_v11 = vpop.eup %320 }
 0x30a   :  { %v236_v14 = vmul.f32 %v321_v11, %v220_v56 }
 0x30c   :  { %v242_v15 = vmul.f32 %v241_v10, %v236_v14 }
 0x30d   :  { %v323_v16 = vpop.eup %322 }
 0x30e   :  { %v248_v17 = vadd.f32 %v247_v13, %v242_v15  ;;  %v237_v18 = vmul.f32 %v323_v16, %v221_v60 }
 0x310   :  { %v276_v19 = vpack.c.bf16 %v248_v17, %v248_v17  ;;  %v243_v20 = vmul.f32 %v241_v10, %v237_v18 }
 0x312   :  { %259 = vst.msk [vmem:[%s428_s7] sm:$0xf] %vm258_vm3, %v276_v19  ;;  %v249_v21 = vadd.f32 %v247_v13, %v243_v20 }
 0x314   :  { %v277_v22 = vpack.c.bf16 %v249_v21, %v249_v21 }
 0x316   :  { %260 = vst.msk [vmem:[%s428_s7 + $0x4] sm:$0xf] %vm258_vm3, %v277_v22 }

// kernel: bert_lr_last4layer_forward.99
= control target key start
LH: loop header
LB: loop body
LE: loop exit
PB: predicated region body
PF: predicated region fallthrough
CT: control target
= control target key end

     0   :  { %v276_v2 = vmov 0.0|0.0   ;;  %vm277_vm0 = vmmov 0   ;;  %v278_v3 = vmov 0.0   ;;  %vm26_vm1 = vcmask 261120   ;;  %s357_s0 = inlined_call_operand.vmem [shape: bf16[2,8,32], index: 0, kind: input, shape index: {}]   ;;  %s358_s1 = inlined_call_operand.vmem [shape: bf16[2,8,32], index: 1, kind: input, shape index: {}]   ;;  %s359_s2 = inlined_call_operand.vmem [shape: bf16[2,8,32], index: 2, kind: input, shape index: {}]   ;;  %s360_s3 = inlined_call_operand.vmem [shape: bf16[2,8,32], index: 3, kind: input, shape index: {}]   ;;  %s361_s4 = inlined_call_operand.vmem [shape: bf16[32,3], index: 4, kind: input, shape index: {}]   ;;  %s362_s5 = inlined_call_operand.vmem [shape: bf16[1,3], index: 5, kind: input, shape index: {}]   ;;  %s363_s6 = inlined_call_operand.hbm [shape: f32[2,3], index: 6, kind: output, shape index: {}]  }
   0x1   :  { %v218_v0 = vld [vmem:[%s361_s4] sm:$0xff]   ;;  %242 = vmatprep.subr.bf16.mxu0 %v276_v2  ;;  %239 = vmatprep.mubr.msk.f32.mxu0 %vm277_vm0, %v278_v3 }
   0x2   :  { %v24_v1 = vld [vmem:[%s357_s0] sm:$0xff]   ;;  %244 = vmatpush3.bf16.msra.mxu0 %v218_v0 }
   0x3   :  { %v25_v4 = vunpack.c.l.bf16 %v24_v1  ;;  %v34_v5 = vld [vmem:[%s358_s1] sm:$0xff]   ;;  %v66_v8 = vunpack.c.h.bf16 %v24_v1 }
   0x4   :  { %v44_v6 = vld [vmem:[%s359_s2] sm:$0xff]   ;;  %v35_v9 = vunpack.c.l.bf16 %v34_v5  ;;  %v76_v12 = vunpack.c.h.bf16 %v34_v5 }
   0x5   :  { %v54_v7 = vld [vmem:[%s360_s3] sm:$0xff]   ;;  %v45_v10 = vunpack.c.l.bf16 %v44_v6 }
   0x6   :  { %v55_v11 = vunpack.c.l.bf16 %v54_v7 }
   0x7   :  { %11 = vsyncpa [#allocation3], 0  ;;  %245 = vmatprep.subr.bf16.mxu0 %v276_v2  ;;  %v225_v13 = vld [vmem:[%s361_s4 + $0x8] sm:$0xff]   ;;  %v27_v14 = vsel %vm26_vm1, %v25_v4, -inf  ;;  %v67_v15 = vsel %vm26_vm1, %v66_v8, -inf  ;;  %v87_v16 = vunpack.c.h.bf16 %v44_v6  ;;  %v98_v17 = vunpack.c.h.bf16 %v54_v7  ;;  %s279_s3 = smov [#allocation2]  }
   0x8   :  { %v28_v18 = vrot.slane %v27_v14, 4  ;;  %v36_v19 = vsel %vm26_vm1, %v35_v9, -inf  ;;  %v46_v20 = vsel %vm26_vm1, %v45_v10, -inf  ;;  %v56_v21 = vsel %vm26_vm1, %v55_v11, -inf  ;;  %247 = vmatpush3.bf16.msra.mxu0 %v225_v13  ;;  %s204_s4 = sshll.u32 %s279_s3, 4  ;;  %s205_s4 = int_to_ptr.vmem [resolvable:$true] %s204_s4 }
   0x9   :  { %v37_v22 = vrot.slane %v36_v19, 4  ;;  %v47_v23 = vrot.slane %v46_v20, 4  ;;  %v57_v24 = vrot.slane %v56_v21, 4  ;;  %v68_v25 = vrot.slane %v67_v15, 4  ;;  %s252_s8 = scalar_lea.vmem %s205_s4, 32  ;;  %p257_p1 = scmp.lt.s32.totalorder %s205_s4, %s205_s4 }
   0xa   :  { %v29_v26 = vmax.f32 %v27_v14, %v28_v18  ;;  %v77_v27 = vsel %vm26_vm1, %v76_v12, -inf  ;;  %v88_v28 = vsel %vm26_vm1, %v87_v16, -inf  ;;  %v99_v29 = vsel %vm26_vm1, %v98_v17, -inf  ;;  %v117_v17 = vld [vmem:[%s362_s5] sm:$0x1]  ;;  %p253_p0 = scmp.ne.s32.totalorder %s205_s4, %s252_s8  ;;  %p258_p2 = scmp.lt.s32.totalorder %s252_s8, %s252_s8 }
   0xb   :  { %v38_v30 = vmax.f32 %v36_v19, %v37_v22  ;;  %v48_v31 = vmax.f32 %v46_v20, %v47_v23  ;;  %v58_v32 = vmax.f32 %v56_v21, %v57_v24  ;;  %v69_v33 = vmax.f32 %v67_v15, %v68_v25 }
   0xc   :  { %v30_v34 = vrot.slane %v29_v26, 2  ;;  %v78_v35 = vrot.slane %v77_v27, 4  ;;  %v89_v36 = vrot.slane %v88_v28, 4  ;;  %v100_v37 = vrot.slane %v99_v29, 4  ;;  %p259_p3 = por %p258_p2, %p257_p1 }
   0xd   :  { %v39_v38 = vrot.slane %v38_v30, 2  ;;  %v49_v39 = vrot.slane %v48_v31, 2  ;;  %v59_v40 = vrot.slane %v58_v32, 2  ;;  %v70_v41 = vrot.slane %v69_v33, 2 }
   0xe   :  { %v31_v42 = vmax.f32 %v29_v26, %v30_v34  ;;  %v79_v43 = vmax.f32 %v77_v27, %v78_v35  ;;  %v90_v44 = vmax.f32 %v88_v28, %v89_v36  ;;  %v101_v45 = vmax.f32 %v99_v29, %v100_v37  ;;  %p260_p4 = pnand %p259_p3, %p253_p0 }
   0xf   :  { %v40_v46 = vmax.f32 %v38_v30, %v39_v38  ;;  %v50_v47 = vmax.f32 %v48_v31, %v49_v39  ;;  %v60_v48 = vmax.f32 %v58_v32, %v59_v40  ;;  %v71_v49 = vmax.f32 %v69_v33, %v70_v41 }
  0x10   :  { %v32_v50 = vrot.slane %v31_v42, 1  ;;  %v80_v51 = vrot.slane %v79_v43, 2  ;;  %v91_v52 = vrot.slane %v90_v44, 2  ;;  %v102_v53 = vrot.slane %v101_v45, 2 }
  0x11   :  { %v41_v54 = vrot.slane %v40_v46, 1  ;;  %v51_v55 = vrot.slane %v50_v47, 1  ;;  %v61_v56 = vrot.slane %v60_v48, 1  ;;  %v72_v57 = vrot.slane %v71_v49, 1 }
  0x12   :  { %v33_v58 = vmax.f32 %v31_v42, %v32_v50  ;;  %v81_v59 = vmax.f32 %v79_v43, %v80_v51  ;;  %v92_v60 = vmax.f32 %v90_v44, %v91_v52  ;;  %v103_v61 = vmax.f32 %v101_v45, %v102_v53 }
  0x13   :  { %v42_v62 = vmax.f32 %v40_v46, %v41_v54  ;;  %v52_v63 = vmax.f32 %v50_v47, %v51_v55  ;;  %v73_v0 = vmax.f32 %v71_v49, %v72_v57  ;;  %v62_v5 = vmax.f32 %v60_v48, %v61_v56 }
  0x14   :  { %v82_v1 = vrot.slane %v81_v59, 1  ;;  %v93_v2 = vrot.slane %v92_v60, 1  ;;  %v104_v3 = vrot.slane %v103_v61, 1  ;;  %vm107_vm2 = vcmask 1040384  }
  0x15   :  { %v43_v4 = vmax.f32 %v33_v58, %v42_v62  ;;  %v119_v15 = vlaneseq  ;;  %v118_v18 = vunpack.c.l.bf16 %v117_v17  ;;  %vm196_vm3 = vcmask 17408  }
  0x16   :  { %v83_v6 = vmax.f32 %v81_v59, %v82_v1  ;;  %v94_v7 = vmax.f32 %v92_v60, %v93_v2  ;;  %v105_v10 = vmax.f32 %v103_v61, %v104_v3 }
  0x17   :  { %v53_v8 = vmax.f32 %v43_v4, %v52_v63  ;;  %v120_v16 = vshrl.u32 %v119_v15, 7 }
  0x18   :  { %v84_v9 = vmax.f32 %v73_v0, %v83_v6 }
  0x19   :  { %v63_v11 = vmax.f32 %v53_v8, %v62_v5  ;;  %v121_v19 = vsub.s32 0, %v120_v16 }
  0x1a   :  { %v95_v12 = vmax.f32 %v84_v9, %v94_v7 }
  0x1b   :  { %v122_v20 = vrot.slane %v118_v18, %v121_v19 }
  0x1c   :  { %v106_v13 = vmax.f32 %v95_v12, %v105_v10 }
  0x1e   :  { %v108_v14 = vsel %vm107_vm2, %v63_v11, %v106_v13 }
  0x1f   :  { %240 = vmatmul.mubr.msk.f32.vlgmr.msra.gmra.mrb[0].mxu0 %vm26_vm1, %v108_v14 }
  0xf2   :  { %v192_v21 = vpop.f32.mrb[0].mxu0 }
  0xf3   :  { %v193_v22 = vadd.f32 %v192_v21, %v122_v20  ;;  %v241_v23 = vpop.f32.mrb[1].mxu0 }
  0xf5   :  { %197 = vst.msk [vmem:[#allocation2] sm:$0x3] %vm196_vm3, %v193_v22 }
  0xf6   :  { %263 = shalt.err (!%p260_p4)
}
  0xf7   :  { %s264_s10 = scalar_lea.hbm %s363_s6, 32 }
  0xf8   :  { %p265_p5 = scmp.ne.s32.totalorder %s363_s6, %s264_s10  ;;  %p268_p6 = scmp.lt.u32.totalorder %s264_s10, %s363_s6 }
  0xfa   :  { %p270_p7 = pnand %p268_p6, %p265_p5 }
  0xfc   :  { %273 = shalt.err (!%p270_p7)
}
  0xfd   :  { %207 = dma.vmem_to_hbm [thread:$0]  %s205_s4, 32, %s363_s6, [#allocation3]  }
  0xfe   :  { %274 = dma.done.wait [#allocation3], 32  }
  0xff   :  { %275 = vsyncadd [#allocation3], 4294967264 }
 0x100   :  { %211 = vsyncpa [#allocation3], 1 }

</bundles_post_ra>
